<compile_context>
chip_gen: v5e
topology: v5e:2x2
jax: 0.10.0
libtpu: 0.0.40
codegen_flags: <defaults>
</compile_context>

<pallas_src>
import functools

import jax
import jax.numpy as jnp
from jax import lax
from jax.experimental import pallas as pl
from jax.experimental.pallas import tpu as pltpu

HIDDEN_SIZE = 64
NUM_LAYERS = 2


def _round_up(x, m):
    return -(-x // m) * m


def genomic_lstm_kernel(x_ref, w_ref, b_ref, wfc_ref, bfc_ref, out_ref,
                        h_s, c_s, *, seq_len, time_tile, input_size, hidden):
    """One (batch_tile, time_tile) grid step of the skewed 2-layer LSTM."""
    H = hidden
    D = input_size
    t_idx = pl.program_id(1)
    n_t = pl.num_programs(1)
    bt = h_s.shape[0]
    ragged = (seq_len % time_tile) != 0

    # Reset the carries at the start of each batch tile's time sweep.
    @pl.when(t_idx == 0)
    def _init():
        h_s[...] = jnp.zeros_like(h_s)
        c_s[...] = jnp.zeros_like(c_s)

    # Hoisted loop invariants (weights, bias broadcast, x block, lane mask).
    w = w_ref[...]                                        # (2H+D, 8H) bf16
    bias = jnp.broadcast_to(b_ref[...], (bt, 8 * H))      # (bt, 8H) f32
    x_blk = x_ref[0]                                      # (bt, t_tile*D) bf16
    is_l1 = lax.broadcasted_iota(jnp.int32, (bt, 2 * H), 1) >= H

    # Carries: h_all = [h0(t-1) | h1(t-2)] (bf16), c_all = [c0(t-1) | c1(t-2)].
    h_all = h_s[...]
    c_all = c_s[...]

    for k in range(time_tile):
        # Static lane slice of the lane-dense x block.
        x_k = x_blk[:, k * D:(k + 1) * D]                 # (bt, D) bf16
        z = jnp.concatenate([h_all, x_k], axis=1)         # (bt, 2H+D) bf16
        # One fused MXU contraction produces layer-0 AND layer-1 gates.
        gates = jnp.dot(z, w, preferred_element_type=jnp.float32) + bias
        # Single sigmoid pass over all 8 gate blocks (g pre-scaled by 2).
        s = jax.nn.sigmoid(gates)
        i_all = s[:, 0 * H:2 * H]
        f_all = s[:, 2 * H:4 * H]
        g_all = 2.0 * s[:, 4 * H:6 * H] - 1.0             # tanh(g)
        o_all = s[:, 6 * H:8 * H]
        c_new = f_all * c_all + i_all * g_all
        h_new = (o_all * jnp.tanh(c_new)).astype(h_all.dtype)

        # Validity masks: layer-0 active for global t < T; layer-1 lanes are
        # one step behind (skip global step 0) and cover times 0..T-2.
        if ragged or k == 0:
            g_t = t_idx * time_tile + k
            if ragged and k == 0:
                valid = jnp.logical_and(
                    g_t < seq_len,
                    jnp.logical_or(g_t >= 1, jnp.logical_not(is_l1)))
            elif ragged:
                valid = g_t < seq_len
            else:  # k == 0 (non-ragged): only layer-1 lanes wait one step
                valid = jnp.logical_or(g_t >= 1, jnp.logical_not(is_l1))
            h_all = jnp.where(valid, h_new, h_all)
            c_all = jnp.where(valid, c_new, c_all)
        else:
            h_all = h_new
            c_all = c_new

    h_s[...] = h_all
    c_s[...] = c_all

    @pl.when(t_idx == n_t - 1)
    def _head():
        # Final (skew-delayed) layer-1 step for time T-1; x rows of W_cmb are
        # zero in the layer-1 columns, so h_all @ W[:2H] is exact.
        rec = jnp.dot(h_all, w[:2 * H, :],
                      preferred_element_type=jnp.float32) + bias
        s = jax.nn.sigmoid(rec)
        i1 = s[:, 1 * H:2 * H]
        f1 = s[:, 3 * H:4 * H]
        g1 = 2.0 * s[:, 5 * H:6 * H] - 1.0
        o1 = s[:, 7 * H:8 * H]
        c1 = f1 * c_all[:, H:2 * H] + i1 * g1
        h1 = o1 * jnp.tanh(c1)
        # fc: Linear(H -> 1) + sigmoid.
        logits = jnp.sum(h1 * wfc_ref[...], axis=1, keepdims=True) + bfc_ref[...]
        out_ref[...] = jax.nn.sigmoid(logits)


def _interleave_gates(m0, m1, hidden):
    """(K,4H) [i|f|g|o] per layer -> (K,8H) [i0 i1 f0 f1 g0 g1 o0 o1]."""
    K = m0.shape[0]
    H = hidden
    return jnp.stack([m0.reshape(K, 4, H), m1.reshape(K, 4, H)],
                     axis=2).reshape(K, 8 * H)


def _prepare_weights(params, input_size, hidden):
    """Build the combined, gate-interleaved, g-scaled weights (bf16 for MXU)."""
    H, D, f32 = hidden, input_size, jnp.float32
    rows_h0 = _interleave_gates(params["w_hh0"].T.astype(f32),
                                params["w_ih1"].T.astype(f32), H)
    rows_h1 = _interleave_gates(jnp.zeros((H, 4 * H), f32),
                                params["w_hh1"].T.astype(f32), H)
    rows_x = _interleave_gates(params["w_ih0"].T.astype(f32),
                               jnp.zeros((D, 4 * H), f32), H)
    w = jnp.concatenate([rows_h0, rows_h1, rows_x], axis=0)        # (2H+D, 8H)
    b0 = (params["b_ih0"] + params["b_hh0"]).astype(f32)[None, :]
    b1 = (params["b_ih1"] + params["b_hh1"]).astype(f32)[None, :]
    bias = _interleave_gates(b0, b1, H)                             # (1, 8H)
    # tanh(g) = 2*sigmoid(2g) - 1  ->  pre-scale the g-gate columns by 2.
    scale4 = jnp.concatenate([jnp.ones((1, 2 * H), f32),
                              jnp.full((1, H), 2.0, f32),
                              jnp.ones((1, H), f32)], axis=1)
    scale8 = _interleave_gates(scale4, scale4, H)
    w = (w * scale8).astype(jnp.bfloat16)
    bias = (bias * scale8).astype(f32)
    wfc = params["w_fc"].reshape(1, H).astype(f32)
    bfc = params["b_fc"].reshape(1, 1).astype(f32)
    return w, bias, wfc, bfc


def _pick_batch_tiling(batch, max_batch_tile):
    """Megacore-aware batch tile: >= 2 batch blocks whenever B_pad > 8."""
    b8 = _round_up(max(batch, 1), 8)
    if b8 <= max_batch_tile:
        bt = max(8, _round_up(-(-b8 // 2), 8))
        if bt >= b8:
            bt = b8
    else:
        bt = max_batch_tile
    return bt, _round_up(b8, bt)


def genomic_lstm_forward(x, params, *, time_tile=32, max_batch_tile=128):
    """x: (B, T, D_in) float32 -> (B, 1) float32 (sigmoid probabilities)."""
    B, T, D = x.shape
    H = HIDDEN_SIZE

    w, bias, wfc, bfc = _prepare_weights(params, D, H)

    b_tile, B_pad = _pick_batch_tiling(B, max_batch_tile)
    t_tile = max(1, min(time_tile, T))
    T_pad = _round_up(T, t_tile)
    n_tt = T_pad // t_tile

    # Lane-dense streamed x layout: (time tiles, B_pad, t_tile*D), bf16.
    x_bf = jnp.pad(x.astype(jnp.bfloat16),
                   ((0, B_pad - B), (0, T_pad - T), (0, 0)))
    x_blk = x_bf.reshape(B_pad, n_tt, t_tile * D).transpose(1, 0, 2)

    kernel = functools.partial(genomic_lstm_kernel, seq_len=T, time_tile=t_tile,
                               input_size=D, hidden=H)

    # Right-sized VMEM budget derived from the chosen tiles (generous slack).
    vmem_est = (4 * b_tile * t_tile * D * 2            # x double buffer
                + 4 * (2 * H + D) * 8 * H * 2          # combined weights
                + b_tile * 2 * H * 6                   # carries (bf16 + f32)
                + 16 * b_tile * 8 * H * 4              # per-step temporaries
                + (2 << 20))
    vmem_limit = int(max(16 << 20, min(48 << 20, 2 * vmem_est)))

    out = pl.pallas_call(
        kernel,
        out_shape=jax.ShapeDtypeStruct((B_pad, 1), jnp.float32),
        grid_spec=pltpu.PrefetchScalarGridSpec(
            num_scalar_prefetch=0,
            grid=(B_pad // b_tile, n_tt),
            in_specs=[
                pl.BlockSpec((1, b_tile, t_tile * D), lambda b, t: (t, b, 0)),
                pl.BlockSpec((2 * H + D, 8 * H), lambda b, t: (0, 0)),
                pl.BlockSpec((1, 8 * H), lambda b, t: (0, 0)),
                pl.BlockSpec((1, H), lambda b, t: (0, 0)),
                pl.BlockSpec((1, 1), lambda b, t: (0, 0)),
            ],
            out_specs=pl.BlockSpec((b_tile, 1), lambda b, t: (b, 0)),
            scratch_shapes=[pltpu.VMEM((b_tile, 2 * H), jnp.bfloat16),
                            pltpu.VMEM((b_tile, 2 * H), jnp.float32)],
        ),
        compiler_params=pltpu.CompilerParams(
            dimension_semantics=("parallel", "arbitrary"),
            vmem_limit_bytes=vmem_limit,
        ),
    )(x_blk, w, bias, wfc, bfc)
    return out[:B]


def _lstm_reference(x, params):
    """Pure-JAX f32 reference of the PyTorch forward pass (verification)."""
    B, T, D = x.shape
    H = HIDDEN_SIZE

    def cell(x_t, h, c, w_ih, w_hh, b_ih, b_hh):
        gates = x_t @ w_ih.T + b_ih + h @ w_hh.T + b_hh
        i, f, g, o = jnp.split(gates, 4, axis=1)
        i, f, o = jax.nn.sigmoid(i), jax.nn.sigmoid(f), jax.nn.sigmoid(o)
        g = jnp.tanh(g)
        c = f * c + i * g
        h = o * jnp.tanh(c)
        return h, c

    def scan_fn(carry, x_t):
        h0, c0, h1, c1 = carry
        h0, c0 = cell(x_t, h0, c0, params["w_ih0"], params["w_hh0"],
                      params["b_ih0"], params["b_hh0"])
        h1, c1 = cell(h0, h1, c1, params["w_ih1"], params["w_hh1"],
                      params["b_ih1"], params["b_hh1"])
        return (h0, c0, h1, c1), None

    z = jnp.zeros((B, H), jnp.float32)
    (h0, c0, h1, c1), _ = lax.scan(scan_fn, (z, z, z, z),
                                   jnp.transpose(x, (1, 0, 2)))
    logits = h1 @ params["w_fc"].T + params["b_fc"]
    return jax.nn.sigmoid(logits)


def init_params(key, input_size, hidden_size):
    """Deterministic init mirroring nn.LSTM / nn.Linear shapes."""
    H = hidden_size
    bound = 1.0 / jnp.sqrt(H)
    keys = jax.random.split(key, 10)
    u = lambda k, shape: jax.random.uniform(k, shape, jnp.float32, -bound, bound)
    return {
        "w_ih0": u(keys[0], (4 * H, input_size)),
        "w_hh0": u(keys[1], (4 * H, H)),
        "b_ih0": u(keys[2], (4 * H,)),
        "b_hh0": u(keys[3], (4 * H,)),
        "w_ih1": u(keys[4], (4 * H, H)),
        "w_hh1": u(keys[5], (4 * H, H)),
        "b_ih1": u(keys[6], (4 * H,)),
        "b_hh1": u(keys[7], (4 * H,)),
        "w_fc": u(keys[8], (1, H)),
        "b_fc": u(keys[9], (1,)),
    }


if __name__ == "__main__":
    B, T, D_IN = 2, 8, 16
    key = jax.random.PRNGKey(0)
    k_x, k_p = jax.random.split(key)
    x = jax.random.normal(k_x, (B, T, D_IN), jnp.float32)
    params = init_params(k_p, D_IN, HIDDEN_SIZE)

    out = genomic_lstm_forward(x, params)
    out = jax.block_until_ready(out)

    ref = _lstm_reference(x, params)
    assert out.shape == (B, 1), out.shape
    max_err = float(jnp.max(jnp.abs(out - ref)))
    # bf16 MXU operands => ~1e-3-level agreement with the f32 reference.
    assert max_err < 5e-3, (out, ref, max_err)

    print("KERNEL_OK")
</pallas_src>

<mosaic_0001>
module attributes {stable_mosaic.version = 11 : i64} {
  func.func @genomic_lstm_kernel(%arg0: i32, %arg1: i32, %arg2: memref<1x8x128xbf16, #tpu.memory_space<vmem>>, %arg3: memref<144x512xbf16, #tpu.memory_space<vmem>>, %arg4: memref<1x512xf32, #tpu.memory_space<vmem>>, %arg5: memref<1x64xf32, #tpu.memory_space<vmem>>, %arg6: memref<1x1xf32, #tpu.memory_space<vmem>>, %arg7: memref<8x1xf32, #tpu.memory_space<vmem>>, %arg8: memref<8x128xbf16, #tpu.memory_space<vmem>>, %arg9: memref<8x128xf32, #tpu.memory_space<vmem>>) attributes {dimension_semantics = [#tpu.dimension_semantics<parallel>, #tpu.dimension_semantics<arbitrary>], iteration_bounds = array<i64: 1, 1>, scalar_prefetch = 0 : i64, scratch_operands = 2 : i64, tpu.core_type = #tpu.core_type<tc>, window_params = [{transform_indices = @transform_0, window_bounds = array<i64: 1, 8, 128>}, {pipeline_mode = #tpu.pipeline_mode<synchronous>, transform_indices = @transform_1, window_bounds = array<i64: 144, 512>}, {pipeline_mode = #tpu.pipeline_mode<synchronous>, transform_indices = @transform_2, window_bounds = array<i64: 1, 512>}, {pipeline_mode = #tpu.pipeline_mode<synchronous>, transform_indices = @transform_3, window_bounds = array<i64: 1, 64>}, {pipeline_mode = #tpu.pipeline_mode<synchronous>, transform_indices = @transform_4, window_bounds = array<i64: 1, 1>}, {transform_indices = @transform_5, window_bounds = array<i64: 8, 1>}]} {
    %c0_i32 = arith.constant 0 : i32
    %0 = arith.cmpi eq, %arg1, %c0_i32 : i32
    %1 = arith.extui %0 : i1 to i32
    %c0_i32_0 = arith.constant 0 : i32
    %2 = arith.cmpi ne, %1, %c0_i32_0 : i32
    scf.if %2 {
      %cst_50 = arith.constant 0.000000e+00 : bf16
      %211 = vector.broadcast %cst_50 : bf16 to vector<8x128xbf16>
      %c0_51 = arith.constant 0 : index
      %c0_52 = arith.constant 0 : index
      %212 = vector.load %arg8[%c0_51, %c0_52] : memref<8x128xbf16, #tpu.memory_space<vmem>>, vector<8x128xbf16>
      tpu.vector_store %arg8[%c0_51, %c0_52], %211 {strides = array<i32>} : memref<8x128xbf16, #tpu.memory_space<vmem>>, vector<8x128xbf16>,
      %cst_53 = arith.constant 0.000000e+00 : f32
      %213 = vector.broadcast %cst_53 : f32 to vector<8x128xf32>
      %c0_54 = arith.constant 0 : index
      %c0_55 = arith.constant 0 : index
      %214 = vector.load %arg9[%c0_54, %c0_55] : memref<8x128xf32, #tpu.memory_space<vmem>>, vector<8x128xf32>
      tpu.vector_store %arg9[%c0_54, %c0_55], %213 {strides = array<i32>} : memref<8x128xf32, #tpu.memory_space<vmem>>, vector<8x128xf32>,
    } else {
    }
    %c0 = arith.constant 0 : index
    %c0_1 = arith.constant 0 : index
    %3 = vector.load %arg3[%c0, %c0_1] : memref<144x512xbf16, #tpu.memory_space<vmem>>, vector<144x512xbf16>
    %c0_2 = arith.constant 0 : index
    %c0_3 = arith.constant 0 : index
    %4 = vector.load %arg4[%c0_2, %c0_3] : memref<1x512xf32, #tpu.memory_space<vmem>>, vector<1x512xf32>
    %5 = vector.shape_cast %4 : vector<1x512xf32> to vector<1x512xf32>
    %6 = vector.broadcast %5 : vector<1x512xf32> to vector<8x512xf32>
    %c0_4 = arith.constant 0 : index
    %c0_5 = arith.constant 0 : index
    %c0_6 = arith.constant 0 : index
    %7 = vector.load %arg2[%c0_4, %c0_5, %c0_6] : memref<1x8x128xbf16, #tpu.memory_space<vmem>>, vector<1x8x128xbf16>
    %8 = vector.shape_cast %7 : vector<1x8x128xbf16> to vector<8x128xbf16>
    %9 = tpu.iota {dimensions = array<i32: 1>} : vector<8x128xi32>
    %c64_i32 = arith.constant 64 : i32
    %10 = vector.broadcast %c64_i32 : i32 to vector<8x128xi32>
    %11 = arith.cmpi sge, %9, %10 : vector<8x128xi32>
    %c0_7 = arith.constant 0 : index
    %c0_8 = arith.constant 0 : index
    %12 = vector.load %arg8[%c0_7, %c0_8] : memref<8x128xbf16, #tpu.memory_space<vmem>>, vector<8x128xbf16>
    %c0_9 = arith.constant 0 : index
    %c0_10 = arith.constant 0 : index
    %13 = vector.load %arg9[%c0_9, %c0_10] : memref<8x128xf32, #tpu.memory_space<vmem>>, vector<8x128xf32>
    %14 = vector.extract_strided_slice %8 {offsets = [0, 0], sizes = [8, 16], strides = [1, 1]} : vector<8x128xbf16> to vector<8x16xbf16>
    %15 = tpu.concatenate %12, %14 in 1 : vector<8x128xbf16>, vector<8x16xbf16> -> vector<8x144xbf16>
    %cst = arith.constant dense<0.000000e+00> : vector<8x512xf32>
    %16 = tpu.matmul %15, %3, %cst {dimension_numbers = #tpu.dot_dimension_numbers<[1], [0], [0], [1], [0, 0, 1, 1], [], []>} : vector<8x144xbf16>, vector<144x512xbf16>, vector<8x512xf32> -> vector<8x512xf32>
    %17 = arith.addf %16, %6 : vector<8x512xf32>
    %18 = arith.negf %17 : vector<8x512xf32>
    %19 = math.exp %18 : vector<8x512xf32>
    %cst_11 = arith.constant 1.000000e+00 : f32
    %20 = vector.broadcast %cst_11 : f32 to vector<8x512xf32>
    %21 = arith.addf %20, %19 : vector<8x512xf32>
    %22 = arith.divf %20, %21 : vector<8x512xf32>
    %23 = vector.extract_strided_slice %22 {offsets = [0, 0], sizes = [8, 128], strides = [1, 1]} : vector<8x512xf32> to vector<8x128xf32>
    %24 = vector.extract_strided_slice %22 {offsets = [0, 128], sizes = [8, 128], strides = [1, 1]} : vector<8x512xf32> to vector<8x128xf32>
    %25 = vector.extract_strided_slice %22 {offsets = [0, 256], sizes = [8, 128], strides = [1, 1]} : vector<8x512xf32> to vector<8x128xf32>
    %cst_12 = arith.constant 2.000000e+00 : f32
    %26 = vector.broadcast %cst_12 : f32 to vector<8x128xf32>
    %27 = arith.mulf %26, %25 : vector<8x128xf32>
    %cst_13 = arith.constant 1.000000e+00 : f32
    %28 = vector.broadcast %cst_13 : f32 to vector<8x128xf32>
    %29 = arith.subf %27, %28 : vector<8x128xf32>
    %30 = vector.extract_strided_slice %22 {offsets = [0, 384], sizes = [8, 128], strides = [1, 1]} : vector<8x512xf32> to vector<8x128xf32>
    %31 = arith.mulf %24, %13 : vector<8x128xf32>
    %32 = arith.mulf %23, %29 : vector<8x128xf32>
    %33 = arith.addf %31, %32 : vector<8x128xf32>
    %34 = math.tanh %33 : vector<8x128xf32>
    %35 = arith.mulf %30, %34 : vector<8x128xf32>
    %36 = arith.truncf %35 : vector<8x128xf32> to vector<8x128xbf16>
    %c8_i32 = arith.constant 8 : i32
    %37 = arith.muli %arg1, %c8_i32 : i32
    %c0_i32_14 = arith.constant 0 : i32
    %38 = arith.addi %37, %c0_i32_14 : i32
    %c1_i32 = arith.constant 1 : i32
    %39 = arith.cmpi sge, %38, %c1_i32 : i32
    %cst_15 = arith.constant dense<true> : vector<8x128xi1>
    %40 = arith.xori %11, %cst_15 : vector<8x128xi1>
    %41 = vector.broadcast %39 : i1 to vector<8x128xi1>
    %42 = arith.ori %41, %40 : vector<8x128xi1>
    %43 = arith.select %42, %36, %12 : vector<8x128xi1>, vector<8x128xbf16>
    %44 = arith.select %42, %33, %13 : vector<8x128xi1>, vector<8x128xf32>
    %45 = vector.extract_strided_slice %8 {offsets = [0, 16], sizes = [8, 16], strides = [1, 1]} : vector<8x128xbf16> to vector<8x16xbf16>
    %46 = tpu.concatenate %43, %45 in 1 : vector<8x128xbf16>, vector<8x16xbf16> -> vector<8x144xbf16>
    %cst_16 = arith.constant dense<0.000000e+00> : vector<8x512xf32>
    %47 = tpu.matmul %46, %3, %cst_16 {dimension_numbers = #tpu.dot_dimension_numbers<[1], [0], [0], [1], [0, 0, 1, 1], [], []>} : vector<8x144xbf16>, vector<144x512xbf16>, vector<8x512xf32> -> vector<8x512xf32>
    %48 = arith.addf %47, %6 : vector<8x512xf32>
    %49 = arith.negf %48 : vector<8x512xf32>
    %50 = math.exp %49 : vector<8x512xf32>
    %cst_17 = arith.constant 1.000000e+00 : f32
    %51 = vector.broadcast %cst_17 : f32 to vector<8x512xf32>
    %52 = arith.addf %51, %50 : vector<8x512xf32>
    %53 = arith.divf %51, %52 : vector<8x512xf32>
    %54 = vector.extract_strided_slice %53 {offsets = [0, 0], sizes = [8, 128], strides = [1, 1]} : vector<8x512xf32> to vector<8x128xf32>
    %55 = vector.extract_strided_slice %53 {offsets = [0, 128], sizes = [8, 128], strides = [1, 1]} : vector<8x512xf32> to vector<8x128xf32>
    %56 = vector.extract_strided_slice %53 {offsets = [0, 256], sizes = [8, 128], strides = [1, 1]} : vector<8x512xf32> to vector<8x128xf32>
    %cst_18 = arith.constant 2.000000e+00 : f32
    %57 = vector.broadcast %cst_18 : f32 to vector<8x128xf32>
    %58 = arith.mulf %57, %56 : vector<8x128xf32>
    %cst_19 = arith.constant 1.000000e+00 : f32
    %59 = vector.broadcast %cst_19 : f32 to vector<8x128xf32>
    %60 = arith.subf %58, %59 : vector<8x128xf32>
    %61 = vector.extract_strided_slice %53 {offsets = [0, 384], sizes = [8, 128], strides = [1, 1]} : vector<8x512xf32> to vector<8x128xf32>
    %62 = arith.mulf %55, %44 : vector<8x128xf32>
    %63 = arith.mulf %54, %60 : vector<8x128xf32>
    %64 = arith.addf %62, %63 : vector<8x128xf32>
    %65 = math.tanh %64 : vector<8x128xf32>
    %66 = arith.mulf %61, %65 : vector<8x128xf32>
    %67 = arith.truncf %66 : vector<8x128xf32> to vector<8x128xbf16>
    %68 = vector.extract_strided_slice %8 {offsets = [0, 32], sizes = [8, 16], strides = [1, 1]} : vector<8x128xbf16> to vector<8x16xbf16>
    %69 = tpu.concatenate %67, %68 in 1 : vector<8x128xbf16>, vector<8x16xbf16> -> vector<8x144xbf16>
    %cst_20 = arith.constant dense<0.000000e+00> : vector<8x512xf32>
    %70 = tpu.matmul %69, %3, %cst_20 {dimension_numbers = #tpu.dot_dimension_numbers<[1], [0], [0], [1], [0, 0, 1, 1], [], []>} : vector<8x144xbf16>, vector<144x512xbf16>, vector<8x512xf32> -> vector<8x512xf32>
    %71 = arith.addf %70, %6 : vector<8x512xf32>
    %72 = arith.negf %71 : vector<8x512xf32>
    %73 = math.exp %72 : vector<8x512xf32>
    %cst_21 = arith.constant 1.000000e+00 : f32
    %74 = vector.broadcast %cst_21 : f32 to vector<8x512xf32>
    %75 = arith.addf %74, %73 : vector<8x512xf32>
    %76 = arith.divf %74, %75 : vector<8x512xf32>
    %77 = vector.extract_strided_slice %76 {offsets = [0, 0], sizes = [8, 128], strides = [1, 1]} : vector<8x512xf32> to vector<8x128xf32>
    %78 = vector.extract_strided_slice %76 {offsets = [0, 128], sizes = [8, 128], strides = [1, 1]} : vector<8x512xf32> to vector<8x128xf32>
    %79 = vector.extract_strided_slice %76 {offsets = [0, 256], sizes = [8, 128], strides = [1, 1]} : vector<8x512xf32> to vector<8x128xf32>
    %cst_22 = arith.constant 2.000000e+00 : f32
    %80 = vector.broadcast %cst_22 : f32 to vector<8x128xf32>
    %81 = arith.mulf %80, %79 : vector<8x128xf32>
    %cst_23 = arith.constant 1.000000e+00 : f32
    %82 = vector.broadcast %cst_23 : f32 to vector<8x128xf32>
    %83 = arith.subf %81, %82 : vector<8x128xf32>
    %84 = vector.extract_strided_slice %76 {offsets = [0, 384], sizes = [8, 128], strides = [1, 1]} : vector<8x512xf32> to vector<8x128xf32>
    %85 = arith.mulf %78, %64 : vector<8x128xf32>
    %86 = arith.mulf %77, %83 : vector<8x128xf32>
    %87 = arith.addf %85, %86 : vector<8x128xf32>
    %88 = math.tanh %87 : vector<8x128xf32>
    %89 = arith.mulf %84, %88 : vector<8x128xf32>
    %90 = arith.truncf %89 : vector<8x128xf32> to vector<8x128xbf16>
    %91 = vector.extract_strided_slice %8 {offsets = [0, 48], sizes = [8, 16], strides = [1, 1]} : vector<8x128xbf16> to vector<8x16xbf16>
    %92 = tpu.concatenate %90, %91 in 1 : vector<8x128xbf16>, vector<8x16xbf16> -> vector<8x144xbf16>
    %cst_24 = arith.constant dense<0.000000e+00> : vector<8x512xf32>
    %93 = tpu.matmul %92, %3, %cst_24 {dimension_numbers = #tpu.dot_dimension_numbers<[1], [0], [0], [1], [0, 0, 1, 1], [], []>} : vector<8x144xbf16>, vector<144x512xbf16>, vector<8x512xf32> -> vector<8x512xf32>
    %94 = arith.addf %93, %6 : vector<8x512xf32>
    %95 = arith.negf %94 : vector<8x512xf32>
    %96 = math.exp %95 : vector<8x512xf32>
    %cst_25 = arith.constant 1.000000e+00 : f32
    %97 = vector.broadcast %cst_25 : f32 to vector<8x512xf32>
    %98 = arith.addf %97, %96 : vector<8x512xf32>
    %99 = arith.divf %97, %98 : vector<8x512xf32>
    %100 = vector.extract_strided_slice %99 {offsets = [0, 0], sizes = [8, 128], strides = [1, 1]} : vector<8x512xf32> to vector<8x128xf32>
    %101 = vector.extract_strided_slice %99 {offsets = [0, 128], sizes = [8, 128], strides = [1, 1]} : vector<8x512xf32> to vector<8x128xf32>
    %102 = vector.extract_strided_slice %99 {offsets = [0, 256], sizes = [8, 128], strides = [1, 1]} : vector<8x512xf32> to vector<8x128xf32>
    %cst_26 = arith.constant 2.000000e+00 : f32
    %103 = vector.broadcast %cst_26 : f32 to vector<8x128xf32>
    %104 = arith.mulf %103, %102 : vector<8x128xf32>
    %cst_27 = arith.constant 1.000000e+00 : f32
    %105 = vector.broadcast %cst_27 : f32 to vector<8x128xf32>
    %106 = arith.subf %104, %105 : vector<8x128xf32>
    %107 = vector.extract_strided_slice %99 {offsets = [0, 384], sizes = [8, 128], strides = [1, 1]} : vector<8x512xf32> to vector<8x128xf32>
    %108 = arith.mulf %101, %87 : vector<8x128xf32>
    %109 = arith.mulf %100, %106 : vector<8x128xf32>
    %110 = arith.addf %108, %109 : vector<8x128xf32>
    %111 = math.tanh %110 : vector<8x128xf32>
    %112 = arith.mulf %107, %111 : vector<8x128xf32>
    %113 = arith.truncf %112 : vector<8x128xf32> to vector<8x128xbf16>
    %114 = vector.extract_strided_slice %8 {offsets = [0, 64], sizes = [8, 16], strides = [1, 1]} : vector<8x128xbf16> to vector<8x16xbf16>
    %115 = tpu.concatenate %113, %114 in 1 : vector<8x128xbf16>, vector<8x16xbf16> -> vector<8x144xbf16>
    %cst_28 = arith.constant dense<0.000000e+00> : vector<8x512xf32>
    %116 = tpu.matmul %115, %3, %cst_28 {dimension_numbers = #tpu.dot_dimension_numbers<[1], [0], [0], [1], [0, 0, 1, 1], [], []>} : vector<8x144xbf16>, vector<144x512xbf16>, vector<8x512xf32> -> vector<8x512xf32>
    %117 = arith.addf %116, %6 : vector<8x512xf32>
    %118 = arith.negf %117 : vector<8x512xf32>
    %119 = math.exp %118 : vector<8x512xf32>
    %cst_29 = arith.constant 1.000000e+00 : f32
    %120 = vector.broadcast %cst_29 : f32 to vector<8x512xf32>
    %121 = arith.addf %120, %119 : vector<8x512xf32>
    %122 = arith.divf %120, %121 : vector<8x512xf32>
    %123 = vector.extract_strided_slice %122 {offsets = [0, 0], sizes = [8, 128], strides = [1, 1]} : vector<8x512xf32> to vector<8x128xf32>
    %124 = vector.extract_strided_slice %122 {offsets = [0, 128], sizes = [8, 128], strides = [1, 1]} : vector<8x512xf32> to vector<8x128xf32>
    %125 = vector.extract_strided_slice %122 {offsets = [0, 256], sizes = [8, 128], strides = [1, 1]} : vector<8x512xf32> to vector<8x128xf32>
    %cst_30 = arith.constant 2.000000e+00 : f32
    %126 = vector.broadcast %cst_30 : f32 to vector<8x128xf32>
    %127 = arith.mulf %126, %125 : vector<8x128xf32>
    %cst_31 = arith.constant 1.000000e+00 : f32
    %128 = vector.broadcast %cst_31 : f32 to vector<8x128xf32>
    %129 = arith.subf %127, %128 : vector<8x128xf32>
    %130 = vector.extract_strided_slice %122 {offsets = [0, 384], sizes = [8, 128], strides = [1, 1]} : vector<8x512xf32> to vector<8x128xf32>
    %131 = arith.mulf %124, %110 : vector<8x128xf32>
    %132 = arith.mulf %123, %129 : vector<8x128xf32>
    %133 = arith.addf %131, %132 : vector<8x128xf32>
    %134 = math.tanh %133 : vector<8x128xf32>
    %135 = arith.mulf %130, %134 : vector<8x128xf32>
    %136 = arith.truncf %135 : vector<8x128xf32> to vector<8x128xbf16>
    %137 = vector.extract_strided_slice %8 {offsets = [0, 80], sizes = [8, 16], strides = [1, 1]} : vector<8x128xbf16> to vector<8x16xbf16>
    %138 = tpu.concatenate %136, %137 in 1 : vector<8x128xbf16>, vector<8x16xbf16> -> vector<8x144xbf16>
    %cst_32 = arith.constant dense<0.000000e+00> : vector<8x512xf32>
    %139 = tpu.matmul %138, %3, %cst_32 {dimension_numbers = #tpu.dot_dimension_numbers<[1], [0], [0], [1], [0, 0, 1, 1], [], []>} : vector<8x144xbf16>, vector<144x512xbf16>, vector<8x512xf32> -> vector<8x512xf32>
    %140 = arith.addf %139, %6 : vector<8x512xf32>
    %141 = arith.negf %140 : vector<8x512xf32>
    %142 = math.exp %141 : vector<8x512xf32>
    %cst_33 = arith.constant 1.000000e+00 : f32
    %143 = vector.broadcast %cst_33 : f32 to vector<8x512xf32>
    %144 = arith.addf %143, %142 : vector<8x512xf32>
    %145 = arith.divf %143, %144 : vector<8x512xf32>
    %146 = vector.extract_strided_slice %145 {offsets = [0, 0], sizes = [8, 128], strides = [1, 1]} : vector<8x512xf32> to vector<8x128xf32>
    %147 = vector.extract_strided_slice %145 {offsets = [0, 128], sizes = [8, 128], strides = [1, 1]} : vector<8x512xf32> to vector<8x128xf32>
    %148 = vector.extract_strided_slice %145 {offsets = [0, 256], sizes = [8, 128], strides = [1, 1]} : vector<8x512xf32> to vector<8x128xf32>
    %cst_34 = arith.constant 2.000000e+00 : f32
    %149 = vector.broadcast %cst_34 : f32 to vector<8x128xf32>
    %150 = arith.mulf %149, %148 : vector<8x128xf32>
    %cst_35 = arith.constant 1.000000e+00 : f32
    %151 = vector.broadcast %cst_35 : f32 to vector<8x128xf32>
    %152 = arith.subf %150, %151 : vector<8x128xf32>
    %153 = vector.extract_strided_slice %145 {offsets = [0, 384], sizes = [8, 128], strides = [1, 1]} : vector<8x512xf32> to vector<8x128xf32>
    %154 = arith.mulf %147, %133 : vector<8x128xf32>
    %155 = arith.mulf %146, %152 : vector<8x128xf32>
    %156 = arith.addf %154, %155 : vector<8x128xf32>
    %157 = math.tanh %156 : vector<8x128xf32>
    %158 = arith.mulf %153, %157 : vector<8x128xf32>
    %159 = arith.truncf %158 : vector<8x128xf32> to vector<8x128xbf16>
    %160 = vector.extract_strided_slice %8 {offsets = [0, 96], sizes = [8, 16], strides = [1, 1]} : vector<8x128xbf16> to vector<8x16xbf16>
    %161 = tpu.concatenate %159, %160 in 1 : vector<8x128xbf16>, vector<8x16xbf16> -> vector<8x144xbf16>
    %cst_36 = arith.constant dense<0.000000e+00> : vector<8x512xf32>
    %162 = tpu.matmul %161, %3, %cst_36 {dimension_numbers = #tpu.dot_dimension_numbers<[1], [0], [0], [1], [0, 0, 1, 1], [], []>} : vector<8x144xbf16>, vector<144x512xbf16>, vector<8x512xf32> -> vector<8x512xf32>
    %163 = arith.addf %162, %6 : vector<8x512xf32>
    %164 = arith.negf %163 : vector<8x512xf32>
    %165 = math.exp %164 : vector<8x512xf32>
    %cst_37 = arith.constant 1.000000e+00 : f32
    %166 = vector.broadcast %cst_37 : f32 to vector<8x512xf32>
    %167 = arith.addf %166, %165 : vector<8x512xf32>
    %168 = arith.divf %166, %167 : vector<8x512xf32>
    %169 = vector.extract_strided_slice %168 {offsets = [0, 0], sizes = [8, 128], strides = [1, 1]} : vector<8x512xf32> to vector<8x128xf32>
    %170 = vector.extract_strided_slice %168 {offsets = [0, 128], sizes = [8, 128], strides = [1, 1]} : vector<8x512xf32> to vector<8x128xf32>
    %171 = vector.extract_strided_slice %168 {offsets = [0, 256], sizes = [8, 128], strides = [1, 1]} : vector<8x512xf32> to vector<8x128xf32>
    %cst_38 = arith.constant 2.000000e+00 : f32
    %172 = vector.broadcast %cst_38 : f32 to vector<8x128xf32>
    %173 = arith.mulf %172, %171 : vector<8x128xf32>
    %cst_39 = arith.constant 1.000000e+00 : f32
    %174 = vector.broadcast %cst_39 : f32 to vector<8x128xf32>
    %175 = arith.subf %173, %174 : vector<8x128xf32>
    %176 = vector.extract_strided_slice %168 {offsets = [0, 384], sizes = [8, 128], strides = [1, 1]} : vector<8x512xf32> to vector<8x128xf32>
    %177 = arith.mulf %170, %156 : vector<8x128xf32>
    %178 = arith.mulf %169, %175 : vector<8x128xf32>
    %179 = arith.addf %177, %178 : vector<8x128xf32>
    %180 = math.tanh %179 : vector<8x128xf32>
    %181 = arith.mulf %176, %180 : vector<8x128xf32>
    %182 = arith.truncf %181 : vector<8x128xf32> to vector<8x128xbf16>
    %183 = vector.extract_strided_slice %8 {offsets = [0, 112], sizes = [8, 16], strides = [1, 1]} : vector<8x128xbf16> to vector<8x16xbf16>
    %184 = tpu.concatenate %182, %183 in 1 : vector<8x128xbf16>, vector<8x16xbf16> -> vector<8x144xbf16>
    %cst_40 = arith.constant dense<0.000000e+00> : vector<8x512xf32>
    %185 = tpu.matmul %184, %3, %cst_40 {dimension_numbers = #tpu.dot_dimension_numbers<[1], [0], [0], [1], [0, 0, 1, 1], [], []>} : vector<8x144xbf16>, vector<144x512xbf16>, vector<8x512xf32> -> vector<8x512xf32>
    %186 = arith.addf %185, %6 : vector<8x512xf32>
    %187 = arith.negf %186 : vector<8x512xf32>
    %188 = math.exp %187 : vector<8x512xf32>
    %cst_41 = arith.constant 1.000000e+00 : f32
    %189 = vector.broadcast %cst_41 : f32 to vector<8x512xf32>
    %190 = arith.addf %189, %188 : vector<8x512xf32>
    %191 = arith.divf %189, %190 : vector<8x512xf32>
    %192 = vector.extract_strided_slice %191 {offsets = [0, 0], sizes = [8, 128], strides = [1, 1]} : vector<8x512xf32> to vector<8x128xf32>
    %193 = vector.extract_strided_slice %191 {offsets = [0, 128], sizes = [8, 128], strides = [1, 1]} : vector<8x512xf32> to vector<8x128xf32>
    %194 = vector.extract_strided_slice %191 {offsets = [0, 256], sizes = [8, 128], strides = [1, 1]} : vector<8x512xf32> to vector<8x128xf32>
    %cst_42 = arith.constant 2.000000e+00 : f32
    %195 = vector.broadcast %cst_42 : f32 to vector<8x128xf32>
    %196 = arith.mulf %195, %194 : vector<8x128xf32>
    %cst_43 = arith.constant 1.000000e+00 : f32
    %197 = vector.broadcast %cst_43 : f32 to vector<8x128xf32>
    %198 = arith.subf %196, %197 : vector<8x128xf32>
    %199 = vector.extract_strided_slice %191 {offsets = [0, 384], sizes = [8, 128], strides = [1, 1]} : vector<8x512xf32> to vector<8x128xf32>
    %200 = arith.mulf %193, %179 : vector<8x128xf32>
    %201 = arith.mulf %192, %198 : vector<8x128xf32>
    %202 = arith.addf %200, %201 : vector<8x128xf32>
    %203 = math.tanh %202 : vector<8x128xf32>
    %204 = arith.mulf %199, %203 : vector<8x128xf32>
    %205 = arith.truncf %204 : vector<8x128xf32> to vector<8x128xbf16>
    %c0_44 = arith.constant 0 : index
    %c0_45 = arith.constant 0 : index
    %206 = vector.load %arg8[%c0_44, %c0_45] : memref<8x128xbf16, #tpu.memory_space<vmem>>, vector<8x128xbf16>
    tpu.vector_store %arg8[%c0_44, %c0_45], %205 {strides = array<i32>} : memref<8x128xbf16, #tpu.memory_space<vmem>>, vector<8x128xbf16>,
    %c0_46 = arith.constant 0 : index
    %c0_47 = arith.constant 0 : index
    %207 = vector.load %arg9[%c0_46, %c0_47] : memref<8x128xf32, #tpu.memory_space<vmem>>, vector<8x128xf32>
    tpu.vector_store %arg9[%c0_46, %c0_47], %202 {strides = array<i32>} : memref<8x128xf32, #tpu.memory_space<vmem>>, vector<8x128xf32>,
    %c0_i32_48 = arith.constant 0 : i32
    %208 = arith.cmpi eq, %arg1, %c0_i32_48 : i32
    %209 = arith.extui %208 : i1 to i32
    %c0_i32_49 = arith.constant 0 : i32
    %210 = arith.cmpi ne, %209, %c0_i32_49 : i32
    scf.if %210 {
      %211 = vector.extract_strided_slice %3 {offsets = [0, 0], sizes = [128, 512], strides = [1, 1]} : vector<144x512xbf16> to vector<128x512xbf16>
      %cst_50 = arith.constant dense<0.000000e+00> : vector<8x512xf32>
      %212 = tpu.matmul %205, %211, %cst_50 {dimension_numbers = #tpu.dot_dimension_numbers<[1], [0], [0], [1], [0, 0, 1, 1], [], []>} : vector<8x128xbf16>, vector<128x512xbf16>, vector<8x512xf32> -> vector<8x512xf32>
      %213 = arith.addf %212, %6 : vector<8x512xf32>
      %214 = arith.negf %213 : vector<8x512xf32>
      %215 = math.exp %214 : vector<8x512xf32>
      %cst_51 = arith.constant 1.000000e+00 : f32
      %216 = vector.broadcast %cst_51 : f32 to vector<8x512xf32>
      %217 = arith.addf %216, %215 : vector<8x512xf32>
      %218 = arith.divf %216, %217 : vector<8x512xf32>
      %219 = vector.extract_strided_slice %218 {offsets = [0, 64], sizes = [8, 64], strides = [1, 1]} : vector<8x512xf32> to vector<8x64xf32>
      %220 = vector.extract_strided_slice %218 {offsets = [0, 192], sizes = [8, 64], strides = [1, 1]} : vector<8x512xf32> to vector<8x64xf32>
      %221 = vector.extract_strided_slice %218 {offsets = [0, 320], sizes = [8, 64], strides = [1, 1]} : vector<8x512xf32> to vector<8x64xf32>
      %cst_52 = arith.constant 2.000000e+00 : f32
      %222 = vector.broadcast %cst_52 : f32 to vector<8x64xf32>
      %223 = arith.mulf %222, %221 : vector<8x64xf32>
      %cst_53 = arith.constant 1.000000e+00 : f32
      %224 = vector.broadcast %cst_53 : f32 to vector<8x64xf32>
      %225 = arith.subf %223, %224 : vector<8x64xf32>
      %226 = vector.extract_strided_slice %218 {offsets = [0, 448], sizes = [8, 64], strides = [1, 1]} : vector<8x512xf32> to vector<8x64xf32>
      %227 = vector.extract_strided_slice %202 {offsets = [0, 64], sizes = [8, 64], strides = [1, 1]} : vector<8x128xf32> to vector<8x64xf32>
      %228 = arith.mulf %220, %227 : vector<8x64xf32>
      %229 = arith.mulf %219, %225 : vector<8x64xf32>
      %230 = arith.addf %228, %229 : vector<8x64xf32>
      %231 = math.tanh %230 : vector<8x64xf32>
      %232 = arith.mulf %226, %231 : vector<8x64xf32>
      %c0_54 = arith.constant 0 : index
      %c0_55 = arith.constant 0 : index
      %233 = vector.load %arg5[%c0_54, %c0_55] : memref<1x64xf32, #tpu.memory_space<vmem>>, vector<1x64xf32>
      %234 = vector.broadcast %233 : vector<1x64xf32> to vector<8x64xf32>
      %235 = arith.mulf %232, %234 : vector<8x64xf32>
      %cst_56 = arith.constant dense<0.000000e+00> : vector<8xf32>
      %236 = vector.multi_reduction <add>, %235, %cst_56 [1] : vector<8x64xf32> to vector<8xf32>
      %237 = vector.shape_cast %236 : vector<8xf32> to vector<8x1xf32>
      %c0_57 = arith.constant 0 : index
      %c0_58 = arith.constant 0 : index
      %238 = vector.load %arg6[%c0_57, %c0_58] : memref<1x1xf32, #tpu.memory_space<vmem>>, vector<1x1xf32>
      %239 = vector.broadcast %238 : vector<1x1xf32> to vector<8x1xf32>
      %240 = arith.addf %237, %239 : vector<8x1xf32>
      %241 = arith.negf %240 : vector<8x1xf32>
      %242 = math.exp %241 : vector<8x1xf32>
      %cst_59 = arith.constant 1.000000e+00 : f32
      %243 = vector.broadcast %cst_59 : f32 to vector<8x1xf32>
      %244 = arith.addf %243, %242 : vector<8x1xf32>
      %245 = arith.divf %243, %244 : vector<8x1xf32>
      %c0_60 = arith.constant 0 : index
      %c0_61 = arith.constant 0 : index
      %246 = vector.load %arg7[%c0_60, %c0_61] : memref<8x1xf32, #tpu.memory_space<vmem>>, vector<8x1xf32>
      tpu.vector_store %arg7[%c0_60, %c0_61], %245 {strides = array<i32>} : memref<8x1xf32, #tpu.memory_space<vmem>>, vector<8x1xf32>,
    } else {
    }
    return
  }
  func.func @transform_0(%arg0: i32, %arg1: i32) -> (i32, i32, i32) {
    %c0_i32 = arith.constant 0 : i32
    %c0_i32_0 = arith.constant 0 : i32
    return %arg1, %arg0, %c0_i32 : i32, i32, i32
  }
  func.func @transform_1(%arg0: i32, %arg1: i32) -> (i32, i32) {
    %c0_i32 = arith.constant 0 : i32
    %c0_i32_0 = arith.constant 0 : i32
    %c0_i32_1 = arith.constant 0 : i32
    return %c0_i32, %c0_i32_0 : i32, i32
  }
  func.func @transform_2(%arg0: i32, %arg1: i32) -> (i32, i32) {
    %c0_i32 = arith.constant 0 : i32
    %c0_i32_0 = arith.constant 0 : i32
    %c0_i32_1 = arith.constant 0 : i32
    return %c0_i32, %c0_i32_0 : i32, i32
  }
  func.func @transform_3(%arg0: i32, %arg1: i32) -> (i32, i32) {
    %c0_i32 = arith.constant 0 : i32
    %c0_i32_0 = arith.constant 0 : i32
    %c0_i32_1 = arith.constant 0 : i32
    return %c0_i32, %c0_i32_0 : i32, i32
  }
  func.func @transform_4(%arg0: i32, %arg1: i32) -> (i32, i32) {
    %c0_i32 = arith.constant 0 : i32
    %c0_i32_0 = arith.constant 0 : i32
    %c0_i32_1 = arith.constant 0 : i32
    return %c0_i32, %c0_i32_0 : i32, i32
  }
  func.func @transform_5(%arg0: i32, %arg1: i32) -> (i32, i32) {
    %c0_i32 = arith.constant 0 : i32
    %c0_i32_0 = arith.constant 0 : i32
    return %arg0, %c0_i32 : i32, i32
  }
}

</mosaic_0001>

<bundles_post_ra>
// kernel: tpu_custom_call.1
= control target key start
LH: loop header
LB: loop body
LE: loop exit
PB: predicated region body
PF: predicated region fallthrough
CT: control target
= control target key end

     0   :  { %s3340_s0 = inlined_call_operand.hbm [shape: bf16[1,8,128], index: 0, kind: input, shape index: {}]   ;;  %s3341_s1 = inlined_call_operand.hbm [shape: bf16[144,512], index: 1, kind: input, shape index: {}]   ;;  %s3342_s2 = inlined_call_operand.hbm [shape: f32[1,512], index: 2, kind: input, shape index: {}]   ;;  %s3343_s3 = inlined_call_operand.vmem [shape: f32[1,64], index: 3, kind: input, shape index: {}]   ;;  %s3344_s4 = inlined_call_operand.<no memory space> [shape: f32[1,1], index: 4, kind: input, shape index: {}]   ;;  %s3345_s5 = inlined_call_operand.vmem [shape: f32[8,1], index: 5, kind: output, shape index: {}]  }
   0x1   :  { %v10_v0 = vstv %s3344_s4 }
   0x2   :  { %11 = vst [vmem:[#allocation4] sm:$0x1] %v10_v0 }
   0x3   :  { %12 = vsyncpa [#allocation6], 0 }
   0x4   :  { %13 = vsyncpa [#allocation8], 0  ;;  %s29_s22 = sshll.u32 %s3341_s1, 4  ;;  %s2562_s23 = smov [#allocation7]   ;;  %s30_s22 = int_to_ptr.hbm [resolvable:$true] %s29_s22 }
   0x5   :  { %s31_s24 = sshll.u32 %s2562_s23, 4  ;;  %s19_s27 = sshll.u32 %s3340_s0, 4  ;;  %s32_s24 = int_to_ptr.vmem [resolvable:$true] %s31_s24  ;;  %s20_s27 = int_to_ptr.hbm [resolvable:$true] %s19_s27 }
   0x6   :  { %s2563_s28 = smov 256   ;;  %s2564_s29 = smov 16  }
   0x7   :  { %37 = dma.hbm_to_vmem [thread:$0]  %s30_s22, 4608, %s32_s24, [#allocation8], %s2563_s28, %s2563_s28, %s2564_s29  }
   0x8   :  { %s2565_s4 = smov [#allocation5]   ;;  %s43_s8 = sshll.u32 %s3342_s2, 4  ;;  %s44_s8 = int_to_ptr.hbm [resolvable:$true] %s43_s8 }
   0x9   :  { %s21_s30 = sshll.u32 %s2565_s4, 4  ;;  %s2566_s1 = smov [#allocation9]   ;;  %s22_s30 = int_to_ptr.vmem [resolvable:$true] %s21_s30 }
   0xa   :  { %24 = dma.hbm_to_vmem [thread:$0]  %s20_s27, 64, %s22_s30, [#allocation6]  }
   0xb   :  { %s45_s9 = sshll.u32 %s2566_s1, 4  ;;  %s46_s9 = int_to_ptr.vmem [resolvable:$true] %s45_s9 }
   0xc   :  { %48 = dma.hbm_to_vmem [thread:$0]  %s44_s8, 64, %s46_s9, [#allocation8]  }
   0xd   :  { %2558 = dma.done.wait [#allocation6], 64  }
   0xe   :  { %2559 = vsyncadd [#allocation6], 4294967232 }
   0xf   :  { %2560 = dma.done.wait [#allocation8], 4672  }
  0x10   :  { %2561 = vsyncadd [#allocation8], 4294962624  ;;  %v2567_v1 = vmov 0   ;;  %vm304_vm0 = vcmask 130048   ;;  %v2161_v2 = vld [vmem:[#allocation7 + $0xe0] sm:$0xf] }
  0x11   :  { %70 = vst [vmem:[#allocation2] sm:$0xf] %v2567_v1  ;;  %v2299_v3 = vld [vmem:[#allocation7 + $0xec] sm:$0xf0]  ;;  %v2177_v4 = vld [vmem:[#allocation7 + $0x100] sm:$0xf] }
  0x12   :  { %v2618_v5 = vor.u32 %v2299_v3, %v2161_v2  ;;  %v2303_v6 = vld [vmem:[#allocation7 + $0x10c] sm:$0xf0]  ;;  %v2301_v7 = vld [vmem:[#allocation7 + $0x104] sm:$0xf]  ;;  %v2179_v8 = vld [vmem:[#allocation7 + $0x110] sm:$0xf0] }
  0x13   :  { %v2620_v9 = vor.u32 %v2303_v6, %v2177_v4  ;;  %v2622_v10 = vor.u32 %v2301_v7, %v2179_v8  ;;  %v2169_v11 = vld [vmem:[#allocation7 + $0xe8] sm:$0xf]  ;;  %v2300_v12 = vld [vmem:[#allocation7 + $0xf4] sm:$0xf0]  ;;  %v2297_v13 = vld [vmem:[#allocation7 + $0xe4] sm:$0xf] }
  0x14   :  { %308 = vmatpush.bf16.msra.mxu0 %v2618_v5  ;;  %v2625_v14 = vor.u32 %v2300_v12, %v2169_v11  ;;  %v2163_v15 = vld [vmem:[#allocation7 + $0xf0] sm:$0xf0]  ;;  %v2627_v16 = vld [vmem:[#allocation5] sm:$0xf]  ;;  %v2185_v17 = vld [vmem:[#allocation7 + $0x108] sm:$0xf] }
  0x15   :  { %3364 = vst [vmem:[#allocation12_spill] sm:$0xff] %v2620_v9  ;;  %328 = vmatpush.bf16.msra.mxu2 %v2620_v9  ;;  %354 = vmatpush.bf16.msra.mxu3 %v2622_v10  ;;  %v2631_v18 = vor.u32 %v2297_v13, %v2163_v15  ;;  %v507_v19 = vunpack.c.l.b16 %v2627_v16  ;;  %v2304_v20 = vld [vmem:[#allocation7 + $0x114] sm:$0xf0]  ;;  %v2145_v21 = vld [vmem:[#allocation7 + $0xc0] sm:$0xf]  ;;  %s2568_s0 = smov 112  }
  0x16   :  { %3365 = vst [vmem:[#allocation13_spill] sm:$0xff] %v2622_v10  ;;  %v2295_v22 = vld [vmem:[#allocation7 + $0xcc] sm:$0xf0]  ;;  %360 = vmatpush.bf16.msra.mxu1 %v2625_v14  ;;  %v2635_v23 = vor.u32 %v2304_v20, %v2185_v17  ;;  %v2153_v25 = vld [vmem:[#allocation7 + $0xc8] sm:$0xf]  ;;  %s2569_s2 = smov 96  }
  0x17   :  { %v2637_v24 = vor.u32 %v2295_v22, %v2145_v21  ;;  %v2296_v26 = vld [vmem:[#allocation7 + $0xd4] sm:$0xf0]  ;;  %v2298_v27 = vld [vmem:[#allocation7 + $0xec] sm:$0xf]  ;;  %v2640_v28 = vpack.c.b16 %v507_v19, %v507_v19  ;;  %v2171_v30 = vld [vmem:[#allocation7 + $0xf8] sm:$0xf0] }
  0x18   :  { %v2642_v29 = vor.u32 %v2296_v26, %v2153_v25  ;;  %v2293_v31 = vld [vmem:[#allocation7 + $0xc4] sm:$0xf]  ;;  %v2147_v32 = vld [vmem:[#allocation7 + $0xd0] sm:$0xf0]  ;;  %2192 = vmatmul.msk.bf16.vlgmr.msra.gmra.mxu3 %vm304_vm0, %v2627_v16  ;;  %v2647_v33 = vor.u32 %v2298_v27, %v2171_v30  ;;  %v2129_v35 = vld [vmem:[#allocation7 + $0xa0] sm:$0xf]  ;;  %2191 = vmatmul.msk.bf16.vlgmr.msra.gmra.mxu2 %vm304_vm0, %v2627_v16 }
  0x19   :  { %334 = vmatpush.bf16.msrb.mxu2 %v2631_v18  ;;  %3366 = vst [vmem:[#allocation14_spill] sm:$0xff] %v2640_v28  ;;  %309 = vmatpush.bf16.msra.mxu0 %v2637_v24  ;;  %v2649_v34 = vor.u32 %v2293_v31, %v2147_v32  ;;  %v2291_v36 = vld [vmem:[#allocation7 + $0xac] sm:$0xf0]  ;;  %v2137_v37 = vld [vmem:[#allocation7 + $0xa8] sm:$0xf]  ;;  %vm2570_vm14 = vmmov 1  }
  0x1a   :  { %380 = vmatpush.bf16.msrb.mxu3 %v2635_v23  ;;  %v2652_v38 = vor.u32 %v2291_v36, %v2129_v35  ;;  %v2292_v39 = vld [vmem:[#allocation7 + $0xb4] sm:$0xf0]  ;;  %v2294_v40 = vld [vmem:[#allocation7 + $0xcc] sm:$0xf]  ;;  %v2155_v41 = vld [vmem:[#allocation7 + $0xd8] sm:$0xf0]  ;;  %361 = vmatpush.bf16.msra.mxu1 %v2642_v29 }
  0x1b   :  { %v2658_v42 = vor.u32 %v2292_v39, %v2137_v37  ;;  %v2660_v43 = vor.u32 %v2294_v40, %v2155_v41  ;;  %v2289_v44 = vld [vmem:[#allocation7 + $0xa4] sm:$0xf]  ;;  %v2131_v45 = vld [vmem:[#allocation7 + $0xb0] sm:$0xf0]  ;;  %v2113_v46 = vld [vmem:[#allocation7 + $0x80] sm:$0xf]  ;;  %509 = vrot.lane.b32.xlu0 %v2640_v28, %s2568_s0 }
  0x1c   :  { %v2663_v47 = vor.u32 %v2289_v44, %v2131_v45  ;;  %v2287_v48 = vld [vmem:[#allocation7 + $0x8c] sm:$0xf0]  ;;  %v2121_v49 = vld [vmem:[#allocation7 + $0x88] sm:$0xf]  ;;  %v2288_v50 = vld [vmem:[#allocation7 + $0x94] sm:$0xf0] }
  0x1d   :  { %335 = vmatpush.bf16.msrb.mxu2 %v2649_v34  ;;  %310 = vmatpush.bf16.msra.mxu0 %v2652_v38  ;;  %v2667_v51 = vor.u32 %v2287_v48, %v2113_v46  ;;  %v2290_v52 = vld [vmem:[#allocation7 + $0xac] sm:$0xf]  ;;  %v2139_v53 = vld [vmem:[#allocation7 + $0xb8] sm:$0xf0]  ;;  %v2285_v54 = vld [vmem:[#allocation7 + $0x84] sm:$0xf]  ;;  %v2671_v58 = vor.u32 %v2288_v50, %v2121_v49 }
  0x1e   :  { %386 = vmatpush.bf16.msra.mxu3 %v2647_v33  ;;  %v2115_v55 = vld [vmem:[#allocation7 + $0x90] sm:$0xf0]  ;;  %v2097_v56 = vld [vmem:[#allocation7 + $0x60] sm:$0xf]  ;;  %v2283_v57 = vld [vmem:[#allocation7 + $0x6c] sm:$0xf0]  ;;  %362 = vmatpush.bf16.msra.mxu1 %v2658_v42  ;;  %v2673_v59 = vor.u32 %v2290_v52, %v2139_v53 }
  0x1f   :  { %v2105_v60 = vld [vmem:[#allocation7 + $0x68] sm:$0xf]  ;;  %v2676_v61 = vor.u32 %v2285_v54, %v2115_v55  ;;  %v2284_v62 = vld [vmem:[#allocation7 + $0x74] sm:$0xf0]  ;;  %v2286_v63 = vld [vmem:[#allocation7 + $0x8c] sm:$0xf]  ;;  %v2679_v1 = vor.u32 %v2283_v57, %v2097_v56 }
  0x20   :  { %v2123_v0 = vld [vmem:[#allocation7 + $0x98] sm:$0xf0]  ;;  %v2281_v2 = vld [vmem:[#allocation7 + $0x64] sm:$0xf]  ;;  %v2099_v3 = vld [vmem:[#allocation7 + $0x70] sm:$0xf0]  ;;  %v2683_v7 = vor.u32 %v2284_v62, %v2105_v60 }
  0x21   :  { %336 = vmatpush.bf16.msrb.mxu2 %v2663_v47  ;;  %311 = vmatpush.bf16.msra.mxu0 %v2667_v51  ;;  %v2081_v4 = vld [vmem:[#allocation7 + $0x40] sm:$0xf]  ;;  %v2279_v6 = vld [vmem:[#allocation7 + $0x4c] sm:$0xf0]  ;;  %v2685_v8 = vor.u32 %v2286_v63, %v2123_v0  ;;  %v2089_v11 = vld [vmem:[#allocation7 + $0x48] sm:$0xf]  ;;  %v2688_v12 = vor.u32 %v2281_v2, %v2099_v3 }
  0x22   :  { %387 = vmatpush.bf16.msra.mxu3 %v2660_v43  ;;  %363 = vmatpush.bf16.msra.mxu1 %v2671_v58  ;;  %v2280_v13 = vld [vmem:[#allocation7 + $0x54] sm:$0xf0]  ;;  %v2282_v15 = vld [vmem:[#allocation7 + $0x6c] sm:$0xf]  ;;  %v2107_v17 = vld [vmem:[#allocation7 + $0x78] sm:$0xf0]  ;;  %v2691_v19 = vor.u32 %v2279_v6, %v2081_v4 }
  0x23   :  { %v2277_v20 = vld [vmem:[#allocation7 + $0x44] sm:$0xf]  ;;  %v2083_v21 = vld [vmem:[#allocation7 + $0x50] sm:$0xf0]  ;;  %v2065_v22 = vld [vmem:[#allocation7 + $0x20] sm:$0xf]  ;;  %v2695_v26 = vor.u32 %v2280_v13, %v2089_v11  ;;  %v2697_v27 = vor.u32 %v2282_v15, %v2107_v17  ;;  %702 = vrot.lane.b32.xlu0 %v2640_v28, %s2569_s2 }
  0x24   :  { %v2275_v25 = vld [vmem:[#allocation7 + $0x2c] sm:$0xf0]  ;;  %v2073_v30 = vld [vmem:[#allocation7 + $0x28] sm:$0xf]  ;;  %v2700_v31 = vor.u32 %v2277_v20, %v2083_v21  ;;  %v2276_v32 = vld [vmem:[#allocation7 + $0x34] sm:$0xf0] }
  0x25   :  { %337 = vmatpush.bf16.msrb.mxu2 %v2676_v61  ;;  %312 = vmatpush.bf16.msra.mxu0 %v2679_v1  ;;  %v2278_v35 = vld [vmem:[#allocation7 + $0x4c] sm:$0xf]  ;;  %v2091_v36 = vld [vmem:[#allocation7 + $0x58] sm:$0xf0]  ;;  %v2705_v37 = vor.u32 %v2275_v25, %v2065_v22  ;;  %v2273_v39 = vld [vmem:[#allocation7 + $0x24] sm:$0xf]  ;;  %v2709_v46 = vor.u32 %v2276_v32, %v2073_v30 }
  0x26   :  { %388 = vmatpush.bf16.msra.mxu3 %v2673_v59  ;;  %364 = vmatpush.bf16.msra.mxu1 %v2683_v7  ;;  %v2067_v40 = vld [vmem:[#allocation7 + $0x30] sm:$0xf0]  ;;  %v2049_v41 = vld [vmem:[#allocation7] sm:$0xf]  ;;  %v2271_v44 = vld [vmem:[#allocation7 + $0xc] sm:$0xf0]  ;;  %v2711_v48 = vor.u32 %v2278_v35, %v2091_v36 }
  0x27   :  { %v2057_v45 = vld [vmem:[#allocation7 + $0x8] sm:$0xf]  ;;  %v2302_v49 = vld [vmem:[#allocation7 + $0x10c] sm:$0xf]  ;;  %v2187_v50 = vld [vmem:[#allocation7 + $0x118] sm:$0xf0]  ;;  %v2714_v52 = vor.u32 %v2273_v39, %v2067_v40  ;;  %v2717_v56 = vor.u32 %v2271_v44, %v2049_v41 }
  0x28   :  { %2193 = vmatmul.msk.bf16.vlgmr.msrb.gmra.mxu3 %vm304_vm0, %v2627_v16  ;;  %v2272_v53 = vld [vmem:[#allocation7 + $0x14] sm:$0xf0]  ;;  %v2274_v54 = vld [vmem:[#allocation7 + $0x2c] sm:$0xf]  ;;  %v2075_v55 = vld [vmem:[#allocation7 + $0x38] sm:$0xf0]  ;;  %v2719_v62 = vor.u32 %v2302_v49, %v2187_v50 }
  0x29   :  { %338 = vmatpush.bf16.msrb.mxu2 %v2688_v12  ;;  %313 = vmatpush.bf16.msra.mxu0 %v2691_v19  ;;  %v2269_v57 = vld [vmem:[#allocation7 + $0x4] sm:$0xf]  ;;  %v2051_v60 = vld [vmem:[#allocation7 + $0x10] sm:$0xf0]  ;;  %v2723_v63 = vor.u32 %v2272_v53, %v2057_v45  ;;  %v2725_v0 = vor.u32 %v2274_v54, %v2075_v55  ;;  %v2270_v3 = vld [vmem:[#allocation7 + $0xc] sm:$0xf] }
  0x2a   :  { %389 = vmatpush.bf16.msra.mxu3 %v2685_v8  ;;  %365 = vmatpush.bf16.msra.mxu1 %v2695_v26  ;;  %3367 = vst [vmem:[#allocation15_spill] sm:$0xff] %v2719_v62  ;;  %v2728_v2 = vor.u32 %v2269_v57, %v2051_v60  ;;  %v2059_v4 = vld [vmem:[#allocation7 + $0x18] sm:$0xf0]  ;;  %v2731_v6 = vld [vmem:[#allocation2] sm:$0xf]  ;;  %s2571_s10 = smov 80  }
  0x2b   :  { %v2736_v11 = vor.u32 %v2270_v3, %v2059_v4  ;;  %1667 = vrot.lane.b32.xlu0 %v2640_v28, %s2564_s29  ;;  %v108_v20 = vld [vmem:[#allocation9] sm:$0xf]  ;;  %895 = vrot.lane.b32.xlu1 %v2640_v28, %s2571_s10  ;;  %s2572_s11 = smov 64   ;;  %s2573_s12 = smov 48  }
  0x2c   :  { %v2783_v25 = vperm.slane %v108_v20, 0  ;;  %v2785_v30 = vperm.slane %v108_v20, 2  ;;  %v2791_v49 = vperm.slane %v108_v20, 1  ;;  %v2794_v55 = vperm.slane %v108_v20, 3  ;;  %s2574_s13 = smov 32  }
  0x2d   :  { %339 = vmatpush.bf16.msrb.mxu2 %v2700_v31  ;;  %314 = vmatpush.bf16.msra.mxu0 %v2705_v37 }
  0x2e   :  { %390 = vmatpush.bf16.msra.mxu3 %v2697_v27  ;;  %366 = vmatpush.bf16.msra.mxu1 %v2709_v46  ;;  %3368 = vst [vmem:[#allocation16_spill] sm:$0xff] %v2783_v25 }
  0x2f   :  { %3369 = vst [vmem:[#allocation17_spill] sm:$0xff] %v2785_v30 }
  0x30   :  { %3370 = vst [vmem:[#allocation18_spill] sm:$0xff] %v2791_v49 }
  0x31   :  { %340 = vmatpush.bf16.msrb.mxu2 %v2714_v52  ;;  %315 = vmatpush.bf16.msra.mxu0 %v2717_v56  ;;  %3371 = vst [vmem:[#allocation19_spill] sm:$0xff] %v2794_v55 }
  0x32   :  { %391 = vmatpush.bf16.msra.mxu3 %v2711_v48  ;;  %367 = vmatpush.bf16.msra.mxu1 %v2723_v63 }
  0x33   :  { %1088 = vrot.lane.b32.xlu1 %v2640_v28, %s2572_s11 }
  0x34   :  { %316 = vmatmul.bf16.vlgmr.msra.gmra.mxu0 %v2731_v6 }
  0x35   :  { %406 = vmatpush.bf16.msrb.mxu0 %v2719_v62  ;;  %341 = vmatpush.bf16.msrb.mxu2 %v2728_v2 }
  0x36   :  { %392 = vmatpush.bf16.msra.mxu3 %v2725_v0  ;;  %534 = vmatpush.bf16.msrb.mxu1 %v2620_v9 }
  0x37   :  { %368 = vmatmul.bf16.vlgmr.msra.gmra.mxu1 %v2731_v6 }
  0x38   :  { %342 = vmatmul.bf16.vlgmr.msrb.gmra.mxu2 %v2731_v6 }
  0x39   :  { %514 = vmatpush.bf16.msra.mxu2 %v2618_v5  ;;  %540 = vmatpush.bf16.msra.mxu0 %v2631_v18 }
  0x3a   :  { %393 = vmatpush.bf16.msra.mxu3 %v2736_v11  ;;  %560 = vmatpush.bf16.msra.mxu1 %v2622_v10 }
  0x3d   :  { %515 = vmatpush.bf16.msra.mxu2 %v2637_v24  ;;  %394 = vmatmul.bf16.vlgmr.msra.gmra.mxu3 %v2731_v6 }
  0x3e   :  { %566 = vmatpush.bf16.msrb.mxu3 %v2625_v14  ;;  %541 = vmatpush.bf16.msra.mxu0 %v2649_v34 }
  0x41   :  { %516 = vmatpush.bf16.msra.mxu2 %v2652_v38 }
  0x42   :  { %567 = vmatpush.bf16.msrb.mxu3 %v2642_v29  ;;  %542 = vmatpush.bf16.msra.mxu0 %v2663_v47 }
  0x44   :  { %2194 = vmatmul.msk.bf16.vlgmr.msrb.gmra.mxu0 %vm304_vm0, %v2627_v16 }
  0x45   :  { %517 = vmatpush.bf16.msra.mxu2 %v2667_v51 }
  0x46   :  { %568 = vmatpush.bf16.msrb.mxu3 %v2658_v42  ;;  %543 = vmatpush.bf16.msra.mxu0 %v2676_v61 }
  0x49   :  { %518 = vmatpush.bf16.msra.mxu2 %v2679_v1 }
  0x4a   :  { %569 = vmatpush.bf16.msrb.mxu3 %v2671_v58  ;;  %544 = vmatpush.bf16.msra.mxu0 %v2688_v12 }
  0x4d   :  { %519 = vmatpush.bf16.msra.mxu2 %v2691_v19 }
  0x4e   :  { %570 = vmatpush.bf16.msrb.mxu3 %v2683_v7  ;;  %545 = vmatpush.bf16.msra.mxu0 %v2700_v31 }
  0x51   :  { %520 = vmatpush.bf16.msra.mxu2 %v2705_v37 }
  0x52   :  { %571 = vmatpush.bf16.msrb.mxu3 %v2695_v26  ;;  %546 = vmatpush.bf16.msra.mxu0 %v2714_v52 }
  0x55   :  { %521 = vmatpush.bf16.msra.mxu2 %v2717_v56 }
  0x56   :  { %572 = vmatpush.bf16.msrb.mxu3 %v2709_v46  ;;  %547 = vmatpush.bf16.msra.mxu0 %v2728_v2 }
  0x59   :  { %586 = vmatpush.bf16.msrb.mxu2 %v2635_v23 }
  0x5a   :  { %612 = vmatpush.bf16.msrb.mxu0 %v2719_v62  ;;  %573 = vmatpush.bf16.msrb.mxu3 %v2723_v63 }
  0x5e   :  { %727 = vmatpush.bf16.msra.mxu3 %v2620_v9 }
  0x8d   :  { %v2778_v21 = vpop.permute.xlu0 %509 }
  0x8e   :  { %2200 = vmatmul.msk.bf16.vlgmr.msrb.gmra.mxu1 %vm304_vm0, %v2778_v21 }
  0x8f   :  { %592 = vmatpush.bf16.msrb.mxu1 %v2647_v33 }
  0x93   :  { %593 = vmatpush.bf16.msrb.mxu1 %v2660_v43 }
  0x97   :  { %594 = vmatpush.bf16.msrb.mxu1 %v2673_v59 }
  0x9b   :  { %v356_v16 = vpop.f32.mrf.mxu3  ;;  %v330_v13 = vpop.f32.mrf.mxu2  ;;  %595 = vmatpush.bf16.msrb.mxu1 %v2685_v8 }
  0x9e   :  { %2201 = vmatmul.msk.bf16.vlgmr.msra.gmra.mxu1 %vm304_vm0, %v2778_v21 }
  0x9f   :  { %596 = vmatpush.bf16.msrb.mxu1 %v2697_v27 }
  0xa3   :  { %v358_v15 = vpop.f32.mrf.mxu3  ;;  %v332_v17 = vpop.f32.mrf.mxu2  ;;  %597 = vmatpush.bf16.msrb.mxu1 %v2711_v48 }
  0xa7   :  { %598 = vmatpush.bf16.msrb.mxu1 %v2725_v0 }
  0xab   :  { %v382_v22 = vpop.f32.mrf.mxu3  ;;  %599 = vmatpush.bf16.msrb.mxu1 %v2736_v11 }
  0xaf   :  { %753 = vmatpush.bf16.msra.mxu1 %v2622_v10 }
  0xb1   :  { %v317_v32 = vpop.f32.mrf.mxu0 }
  0xb2   :  { %v318_v35 = vadd.f32 %v317_v32, %v2783_v25 }
  0xb3   :  { %v384_v41 = vpop.f32.mrf.mxu3 }
  0xb4   :  { %v369_v36 = vpop.f32.mrf.mxu1  ;;  %v331_v39 = vadd.f32 %v330_v13, %v318_v35 }
  0xb5   :  { %v370_v40 = vadd.f32 %v369_v36, %v2785_v30 }
  0xb6   :  { %v2195_v44 = vmul.f32 -1.442695, %v331_v39 }
  0xb7   :  { %v383_v45 = vadd.f32 %v382_v22, %v370_v40 }
  0xb8   :  { %2320 = vpow2.f32 %v2195_v44 }
  0xb9   :  { %v2197_v50 = vmul.f32 -1.442695, %v383_v45  ;;  %v319_v53 = vpop.f32.mrf.mxu0 }
  0xbb   :  { %2322 = vpow2.f32 %v2197_v50  ;;  %v343_v54 = vpop.f32.mrf.mxu2 }
  0xbc   :  { %v344_v57 = vadd.f32 %v343_v54, %v2791_v49  ;;  %v371_v60 = vpop.f32.mrf.mxu1 }
  0xbe   :  { %v357_v3 = vadd.f32 %v356_v16, %v344_v57  ;;  %v2321_v13 = vpop.eup %2320 }
  0xbf   :  { %v2801_v17 = vadd.f32 1.0, %v2321_v13 }
  0xc0   :  { %v395_v4 = vpop.f32.mrf.mxu3  ;;  %v2196_v22 = vmul.f32 -1.442695, %v357_v3 }
  0xc1   :  { %v396_v15 = vadd.f32 %v395_v4, %v2794_v55  ;;  %v2323_v32 = vpop.eup %2322  ;;  %2324 = vrcp.f32 %v2801_v17  ;;  %v408_v35 = vpop.f32.mrf.mxu0  ;;  %vm433_vm6 = vweird.f32 %v2801_v17  ;;  %v437_v30 = vand.u32 2147483647, %v2801_v17 }
  0xc2   :  { %v426_v20 = vadd.f32 1.0, %v2323_v32  ;;  %2326 = vpow2.f32 %v2196_v22 }
  0xc3   :  { %v345_v36 = vpop.f32.mrf.mxu2  ;;  %v409_v39 = vadd.f32 %v408_v35, %v396_v15  ;;  %v119_v35 = vlaneseq  ;;  %vm438_vm12 = vcmp.eq.f32.partialorder %v437_v30, 8.507059e+37 }
  0xc4   :  { %2328 = vrcp.f32 %v426_v20  ;;  %v469_v13 = vand.u32 2147483648, %v426_v20  ;;  %v467_v32 = vand.u32 2147483647, %v426_v20  ;;  %vm463_vm2 = vweird.f32 %v426_v20 }
  0xc5   :  { %v2198_v16 = vmul.f32 -1.442695, %v409_v39  ;;  %v120_v10 = vand.u32 127, %v119_v35 }
  0xc6   :  { %vm468_vm4 = vcmp.eq.f32.partialorder %v467_v32, 8.507059e+37 }
  0xc7   :  { %2330 = vpow2.f32 %v2198_v16  ;;  %v2325_v41 = vpop.eup %2324  ;;  %vm121_vm10 = vcmp.ge.s32.totalorder %v120_v10, 64 }
  0xc8   :  { %v397_v40 = vpop.f32.mrf.mxu3  ;;  %v2327_v44 = vpop.eup %2326  ;;  %v429_v45 = vmul.f32 %v2325_v41, %v2801_v17  ;;  %vm434_vm5 = vweird.f32 %v2325_v41  ;;  %vm2812_vm15 = vmxor %vm121_vm10, %vm2570_vm14 }
  0xc9   :  { %v425_v53 = vadd.f32 1.0, %v2327_v44  ;;  %v410_v54 = vpop.f32.mrf.mxu0  ;;  %v470_v40 = vor.u32 1.1754944e-38, %v469_v13  ;;  %vm435_vm8 = vmor %vm433_vm6, %vm434_vm5 }
  0xca   :  { %v2329_v50 = vpop.eup %2328  ;;  %v430_v3 = vsub.f32 1.0, %v429_v45  ;;  %vm503_vm5 = vmpackc.low %vm2812_vm15, %vm2812_vm15 }
  0xcb   :  { %v459_v57 = vmul.f32 %v2329_v50, %v426_v20  ;;  %2332 = vrcp.f32 %v425_v53  ;;  %vm464_vm1 = vweird.f32 %v2329_v50  ;;  %v439_v20 = vand.u32 2147483648, %v2801_v17 }
  0xcc   :  { %v431_v36 = vmul.f32 %v2325_v41, %v430_v3  ;;  %vm465_vm3 = vmor %vm463_vm2, %vm464_vm1  ;;  %v454_v3 = vand.u32 2147483648, %v425_v53  ;;  %v452_v13 = vand.u32 2147483647, %v425_v53  ;;  %vm448_vm9 = vweird.f32 %v425_v53 }
  0xcd   :  { %v2331_v60 = vpop.eup %2330  ;;  %v460_v4 = vsub.f32 1.0, %v459_v57 }
  0xce   :  { %v427_v15 = vadd.f32 1.0, %v2331_v60  ;;  %v432_v57 = vadd.f32 %v2325_v41, %v431_v36  ;;  %vm453_vm13 = vcmp.eq.f32.partialorder %v452_v13, 8.507059e+37 }
  0xcf   :  { %v461_v22 = vmul.f32 %v2329_v50, %v460_v4 }
  0xd0   :  { %2334 = vrcp.f32 %v427_v15  ;;  %v436_v32 = vsel %vm435_vm8, %v2325_v41, %v432_v57  ;;  %v484_v10 = vand.u32 2147483648, %v427_v15  ;;  %vm478_vm2 = vweird.f32 %v427_v15 }
  0xd1   :  { %v462_v39 = vadd.f32 %v2329_v50, %v461_v22  ;;  %v2333_v16 = vpop.eup %2332 }
  0xd2   :  { %v444_v44 = vmul.f32 %v2333_v16, %v425_v53  ;;  %vm449_vm7 = vweird.f32 %v2333_v16  ;;  %v482_v53 = vand.u32 2147483647, %v427_v15  ;;  %v485_v57 = vor.u32 1.1754944e-38, %v484_v10 }
  0xd3   :  { %v466_v54 = vsel %vm465_vm3, %v2329_v50, %v462_v39  ;;  %vm450_vm11 = vmor %vm448_vm9, %vm449_vm7  ;;  %v455_v39 = vor.u32 1.1754944e-38, %v454_v3 }
  0xd4   :  { %v471_v9 = vsel %vm468_vm4, %v470_v40, %v466_v54  ;;  %v445_v45 = vsub.f32 1.0, %v444_v44  ;;  %vm483_vm4 = vcmp.eq.f32.partialorder %v482_v53, 8.507059e+37 }
  0xd5   :  { %v488_v60 = vmul.f32 2.0, %v471_v9  ;;  %v440_v9 = vor.u32 1.1754944e-38, %v439_v20 }
  0xd6   :  { %v2335_v4 = vpop.eup %2334  ;;  %v446_v22 = vmul.f32 %v2333_v16, %v445_v45 }
  0xd7   :  { %v474_v55 = vmul.f32 %v2335_v4, %v427_v15  ;;  %v2199_v36 = vadd.f32 -1.0, %v488_v60  ;;  %v441_v44 = vsel %vm438_vm12, %v440_v9, %v436_v32  ;;  %vm479_vm1 = vweird.f32 %v2335_v4 }
  0xd8   :  { %v447_v35 = vadd.f32 %v2333_v16, %v446_v22  ;;  %vm480_vm3 = vmor %vm478_vm2, %vm479_vm1 }
  0xd9   :  { %v475_v50 = vsub.f32 1.0, %v474_v55  ;;  %v491_v25 = vmul.f32 %v2199_v36, %v441_v44 }
  0xda   :  { %v451_v40 = vsel %vm450_vm11, %v2333_v16, %v447_v35 }
  0xdb   :  { %v456_v17 = vsel %vm453_vm13, %v455_v39, %v451_v40  ;;  %v476_v54 = vmul.f32 %v2335_v4, %v475_v50  ;;  %v3374_v50 = vld [vmem:[#allocation18_spill] sm:$0xff]  ;;  %v3375_v40 = vld [vmem:[#allocation16_spill] sm:$0xff] }
  0xdc   :  { %v490_v45 = vmul.f32 0.0, %v456_v17 }
  0xdd   :  { %v477_v41 = vadd.f32 %v2335_v4, %v476_v54 }
  0xde   :  { %v2816_v55 = vadd.f32 %v491_v25, %v490_v45 }
  0xdf   :  { %v481_v16 = vsel %vm480_vm3, %v2335_v4, %v477_v41 }
  0xe0   :  { %2336 = vtanh.f32 %v2816_v55  ;;  %v505_v30 = vsel %vm2812_vm15, %v2816_v55, 0.0  ;;  %v486_v20 = vsel %vm483_vm4, %v485_v57, %v481_v16 }
  0xe6   :  { %v2337_v60 = vpop.eup %2336 }
  0xe7   :  { %v494_v3 = vmul.f32 %v2337_v60, %v486_v20  ;;  %v3376_v20 = vld [vmem:[#allocation19_spill] sm:$0xff] }
  0xe9   :  { %v495_v25 = vpack.c.bf16 %v494_v3, %v494_v3 }
  0xeb   :  { %v504_v22 = vsel %vm503_vm5, %v495_v25, %v2731_v6 }
  0xec   :  { %522 = vmatmul.bf16.vlgmr.msra.gmra.mxu2 %v504_v22  ;;  %548 = vmatmul.bf16.vlgmr.msra.gmra.mxu0 %v504_v22 }
  0xed   :  { %574 = vmatmul.bf16.vlgmr.msrb.gmra.mxu3 %v504_v22  ;;  %600 = vmatmul.bf16.vlgmr.msrb.gmra.mxu1 %v504_v22 }
  0xee   :  { %707 = vmatpush.bf16.msra.mxu2 %v2618_v5  ;;  %733 = vmatpush.bf16.msra.mxu0 %v2631_v18 }
  0xef   :  { %759 = vmatpush.bf16.msrb.mxu3 %v2625_v14  ;;  %785 = vmatpush.bf16.msrb.mxu1 %v2647_v33 }
  0xf2   :  { %708 = vmatpush.bf16.msra.mxu2 %v2637_v24  ;;  %734 = vmatpush.bf16.msra.mxu0 %v2649_v34 }
  0xf3   :  { %760 = vmatpush.bf16.msrb.mxu3 %v2642_v29  ;;  %786 = vmatpush.bf16.msrb.mxu1 %v2660_v43 }
  0xf6   :  { %709 = vmatpush.bf16.msra.mxu2 %v2652_v38  ;;  %735 = vmatpush.bf16.msra.mxu0 %v2663_v47 }
  0xf7   :  { %761 = vmatpush.bf16.msrb.mxu3 %v2658_v42  ;;  %787 = vmatpush.bf16.msrb.mxu1 %v2673_v59 }
  0xfa   :  { %710 = vmatpush.bf16.msra.mxu2 %v2667_v51  ;;  %736 = vmatpush.bf16.msra.mxu0 %v2676_v61 }
  0xfb   :  { %762 = vmatpush.bf16.msrb.mxu3 %v2671_v58  ;;  %788 = vmatpush.bf16.msrb.mxu1 %v2685_v8 }
  0xfc   :  { %2202 = vmatmul.msk.bf16.vlgmr.msrb.gmra.mxu2 %vm304_vm0, %v2778_v21  ;;  %2203 = vmatmul.msk.bf16.vlgmr.msrb.gmra.mxu0 %vm304_vm0, %v2778_v21 }
  0xfe   :  { %711 = vmatpush.bf16.msra.mxu2 %v2679_v1  ;;  %737 = vmatpush.bf16.msra.mxu0 %v2688_v12 }
  0xff   :  { %763 = vmatpush.bf16.msrb.mxu3 %v2683_v7  ;;  %789 = vmatpush.bf16.msrb.mxu1 %v2697_v27 }
 0x102   :  { %712 = vmatpush.bf16.msra.mxu2 %v2691_v19  ;;  %738 = vmatpush.bf16.msra.mxu0 %v2700_v31 }
 0x103   :  { %764 = vmatpush.bf16.msrb.mxu3 %v2695_v26  ;;  %790 = vmatpush.bf16.msrb.mxu1 %v2711_v48 }
 0x106   :  { %713 = vmatpush.bf16.msra.mxu2 %v2705_v37  ;;  %739 = vmatpush.bf16.msra.mxu0 %v2714_v52 }
 0x107   :  { %765 = vmatpush.bf16.msrb.mxu3 %v2709_v46  ;;  %791 = vmatpush.bf16.msrb.mxu1 %v2725_v0 }
 0x10a   :  { %714 = vmatpush.bf16.msra.mxu2 %v2717_v56  ;;  %740 = vmatpush.bf16.msra.mxu0 %v2728_v2 }
 0x10b   :  { %766 = vmatpush.bf16.msrb.mxu3 %v2723_v63  ;;  %792 = vmatpush.bf16.msrb.mxu1 %v2736_v11  ;;  %v536_v6 = vpop.f32.mrf.mxu1 }
 0x10e   :  { %779 = vmatpush.bf16.msrb.mxu2 %v2635_v23  ;;  %805 = vmatpush.bf16.msrb.mxu0 %v2719_v62 }
 0x113   :  { %v538_v21 = vpop.f32.mrf.mxu1 }
 0x11b   :  { %v562_v15 = vpop.f32.mrf.mxu1 }
 0x123   :  { %v564_v4 = vpop.f32.mrf.mxu1 }
 0x169   :  { %v549_v13 = vpop.f32.mrf.mxu0 }
 0x16a   :  { %v550_v32 = vadd.f32 %v549_v13, %v3374_v50  ;;  %v601_v35 = vpop.f32.mrf.mxu1 }
 0x16b   :  { %v602_v3 = vadd.f32 %v601_v35, %v3376_v20 }
 0x16c   :  { %v563_v36 = vadd.f32 %v562_v15, %v550_v32  ;;  %v3377_v15 = vld [vmem:[#allocation17_spill] sm:$0xff] }
 0x16e   :  { %v2205_v9 = vmul.f32 -1.442695, %v563_v36 }
 0x16f   :  { %v523_v39 = vpop.f32.mrf.mxu2 }
 0x170   :  { %2338 = vpow2.f32 %v2205_v9  ;;  %v524_v44 = vadd.f32 %v523_v39, %v3375_v40  ;;  %v575_v17 = vpop.f32.mrf.mxu3  ;;  %v2869_v39 = vpop.permute.xlu0 %702 }
 0x171   :  { %v551_v54 = vpop.f32.mrf.mxu0  ;;  %v576_v4 = vadd.f32 %v575_v17, %v3377_v15  ;;  %2209 = vmatmul.msk.bf16.vlgmr.msra.gmra.mxu3 %vm304_vm0, %v2869_v39  ;;  %2210 = vmatmul.msk.bf16.vlgmr.msra.gmra.mxu1 %vm304_vm0, %v2869_v39  ;;  %v3379_v17 = vld [vmem:[#allocation13_spill] sm:$0xff] }
 0x172   :  { %v537_v45 = vadd.f32 %v536_v6, %v524_v44  ;;  %v603_v41 = vpop.f32.mrf.mxu1  ;;  %946 = vmatpush.bf16.msra.mxu1 %v3379_v17 }
 0x173   :  { %v3378_v41 = vld [vmem:[#allocation12_spill] sm:$0xff] }
 0x174   :  { %v2204_v10 = vmul.f32 -1.442695, %v537_v45  ;;  %920 = vmatpush.bf16.msra.mxu3 %v3378_v41 }
 0x176   :  { %v2339_v53 = vpop.eup %2338  ;;  %2340 = vpow2.f32 %v2204_v10 }
 0x177   :  { %v631_v16 = vadd.f32 1.0, %v2339_v53  ;;  %v525_v57 = vpop.f32.mrf.mxu2 }
 0x178   :  { %v577_v60 = vpop.f32.mrf.mxu3 }
 0x179   :  { %2342 = vrcp.f32 %v631_v16  ;;  %v614_v25 = vpop.f32.mrf.mxu0  ;;  %v660_v10 = vand.u32 2147483648, %v631_v16  ;;  %v658_v57 = vand.u32 2147483647, %v631_v16  ;;  %vm654_vm7 = vweird.f32 %v631_v16 }
 0x17a   :  { %v615_v22 = vadd.f32 %v614_v25, %v602_v3 }
 0x17b   :  { %v661_v3 = vor.u32 1.1754944e-38, %v660_v10  ;;  %vm659_vm9 = vcmp.eq.f32.partialorder %v658_v57, 8.507059e+37 }
 0x17c   :  { %v2341_v21 = vpop.eup %2340  ;;  %v2207_v32 = vmul.f32 -1.442695, %v615_v22 }
 0x17d   :  { %v630_v44 = vadd.f32 1.0, %v2341_v21 }
 0x17e   :  { %2344 = vpow2.f32 %v2207_v32 }
 0x17f   :  { %v2343_v13 = vpop.eup %2342  ;;  %v588_v36 = vpop.f32.mrf.mxu2  ;;  %vm639_vm14 = vweird.f32 %v630_v44 }
 0x180   :  { %v650_v9 = vmul.f32 %v2343_v13, %v631_v16  ;;  %v589_v6 = vadd.f32 %v588_v36, %v576_v4  ;;  %vm655_vm6 = vweird.f32 %v2343_v13 }
 0x181   :  { %v616_v54 = vpop.f32.mrf.mxu0  ;;  %vm656_vm8 = vmor %vm654_vm7, %vm655_vm6 }
 0x182   :  { %v651_v35 = vsub.f32 1.0, %v650_v9  ;;  %v2206_v45 = vmul.f32 -1.442695, %v589_v6 }
 0x184   :  { %v652_v53 = vmul.f32 %v2343_v13, %v651_v35  ;;  %2346 = vpow2.f32 %v2206_v45  ;;  %v2345_v21 = vpop.eup %2344 }
 0x185   :  { %2348 = vrcp.f32 %v630_v44  ;;  %v633_v54 = vadd.f32 1.0, %v2345_v21 }
 0x186   :  { %v653_v60 = vadd.f32 %v2343_v13, %v652_v53 }
 0x187   :  { %v590_v25 = vpop.f32.mrf.mxu2  ;;  %vm684_vm4 = vweird.f32 %v633_v54 }
 0x188   :  { %v657_v22 = vsel %vm656_vm8, %v2343_v13, %v653_v60 }
 0x189   :  { %v662_v4 = vsel %vm659_vm9, %v661_v3, %v657_v22 }
 0x18a   :  { %v2347_v36 = vpop.eup %2346  ;;  %v696_v32 = vmul.f32 %v662_v4, %v505_v30  ;;  %v645_v30 = vand.u32 2147483648, %v630_v44  ;;  %v643_v4 = vand.u32 2147483647, %v630_v44 }
 0x18b   :  { %v2349_v9 = vpop.eup %2348  ;;  %v632_v6 = vadd.f32 1.0, %v2347_v36 }
 0x18c   :  { %v635_v35 = vmul.f32 %v2349_v9, %v630_v44  ;;  %vm640_vm11 = vweird.f32 %v2349_v9  ;;  %vm644_vm2 = vcmp.eq.f32.partialorder %v643_v4, 8.507059e+37  ;;  %v688_v44 = vand.u32 2147483647, %v633_v54 }
 0x18d   :  { %2350 = vrcp.f32 %v632_v6  ;;  %v675_v60 = vand.u32 2147483648, %v632_v6  ;;  %v673_v25 = vand.u32 2147483647, %v632_v6  ;;  %vm669_vm12 = vweird.f32 %v632_v6  ;;  %vm641_vm1 = vmor %vm639_vm14, %vm640_vm11 }
 0x18e   :  { %2352 = vrcp.f32 %v633_v54  ;;  %v636_v16 = vsub.f32 1.0, %v635_v35  ;;  %vm689_vm6 = vcmp.eq.f32.partialorder %v688_v44, 8.507059e+37 }
 0x18f   :  { %v676_v21 = vor.u32 1.1754944e-38, %v675_v60  ;;  %vm674_vm15 = vcmp.eq.f32.partialorder %v673_v25, 8.507059e+37  ;;  %v690_v60 = vand.u32 2147483648, %v633_v54 }
 0x190   :  { %v637_v13 = vmul.f32 %v2349_v9, %v636_v16 }
 0x191   :  { %v691_v25 = vor.u32 1.1754944e-38, %v690_v60  ;;  %v3380_v60 = vld [vmem:[#allocation19_spill] sm:$0xff] }
 0x192   :  { %v638_v22 = vadd.f32 %v2349_v9, %v637_v13 }
 0x193   :  { %v2351_v45 = vpop.eup %2350 }
 0x194   :  { %v665_v10 = vmul.f32 %v2351_v45, %v632_v6  ;;  %v2353_v53 = vpop.eup %2352  ;;  %vm670_vm10 = vweird.f32 %v2351_v45 }
 0x195   :  { %v680_v49 = vmul.f32 %v2353_v53, %v633_v54  ;;  %vm671_vm13 = vmor %vm669_vm12, %vm670_vm10  ;;  %vm685_vm3 = vweird.f32 %v2353_v53 }
 0x196   :  { %v666_v57 = vsub.f32 1.0, %v665_v10  ;;  %v642_v10 = vsel %vm641_vm1, %v2349_v9, %v638_v22  ;;  %vm686_vm5 = vmor %vm684_vm4, %vm685_vm3 }
 0x197   :  { %v681_v35 = vsub.f32 1.0, %v680_v49 }
 0x198   :  { %v667_v3 = vmul.f32 %v2351_v45, %v666_v57  ;;  %v646_v57 = vor.u32 1.1754944e-38, %v645_v30 }
 0x199   :  { %v682_v13 = vmul.f32 %v2353_v53, %v681_v35 }
 0x19a   :  { %v668_v55 = vadd.f32 %v2351_v45, %v667_v3  ;;  %v647_v15 = vsel %vm644_vm2, %v646_v57, %v642_v10 }
 0x19b   :  { %v683_v6 = vadd.f32 %v2353_v53, %v682_v13 }
 0x19c   :  { %v672_v36 = vsel %vm671_vm13, %v2351_v45, %v668_v55 }
 0x19d   :  { %v677_v16 = vsel %vm674_vm15, %v676_v21, %v672_v36  ;;  %v687_v45 = vsel %vm686_vm5, %v2353_v53, %v683_v6 }
 0x19e   :  { %v694_v17 = vmul.f32 2.0, %v677_v16  ;;  %v692_v49 = vsel %vm689_vm6, %v691_v25, %v687_v45 }
 0x1a0   :  { %v2208_v41 = vadd.f32 -1.0, %v694_v17 }
 0x1a2   :  { %v697_v20 = vmul.f32 %v2208_v41, %v647_v15 }
 0x1a4   :  { %v2881_v3 = vadd.f32 %v697_v20, %v696_v32 }
 0x1a6   :  { %2354 = vtanh.f32 %v2881_v3 }
 0x1ac   :  { %v2355_v9 = vpop.eup %2354 }
 0x1ad   :  { %v700_v22 = vmul.f32 %v2355_v9, %v692_v49 }
 0x1af   :  { %v701_v17 = vpack.c.bf16 %v700_v22, %v700_v22 }
 0x1b1   :  { %715 = vmatmul.bf16.vlgmr.msra.gmra.mxu2 %v701_v17  ;;  %741 = vmatmul.bf16.vlgmr.msra.gmra.mxu0 %v701_v17 }
 0x1b2   :  { %767 = vmatmul.bf16.vlgmr.msrb.gmra.mxu3 %v701_v17  ;;  %793 = vmatmul.bf16.vlgmr.msrb.gmra.mxu1 %v701_v17  ;;  %v3381_v17 = vld [vmem:[#allocation17_spill] sm:$0xff] }
 0x1b3   :  { %900 = vmatpush.bf16.msra.mxu2 %v2618_v5  ;;  %926 = vmatpush.bf16.msra.mxu0 %v2631_v18 }
 0x1b4   :  { %952 = vmatpush.bf16.msrb.mxu3 %v2625_v14  ;;  %978 = vmatpush.bf16.msrb.mxu1 %v2647_v33 }
 0x1b7   :  { %901 = vmatpush.bf16.msra.mxu2 %v2637_v24  ;;  %927 = vmatpush.bf16.msra.mxu0 %v2649_v34 }
 0x1b8   :  { %953 = vmatpush.bf16.msrb.mxu3 %v2642_v29  ;;  %979 = vmatpush.bf16.msrb.mxu1 %v2660_v43 }
 0x1bb   :  { %902 = vmatpush.bf16.msra.mxu2 %v2652_v38  ;;  %928 = vmatpush.bf16.msra.mxu0 %v2663_v47 }
 0x1bc   :  { %954 = vmatpush.bf16.msrb.mxu3 %v2658_v42  ;;  %980 = vmatpush.bf16.msrb.mxu1 %v2673_v59 }
 0x1bf   :  { %903 = vmatpush.bf16.msra.mxu2 %v2667_v51  ;;  %929 = vmatpush.bf16.msra.mxu0 %v2676_v61 }
 0x1c0   :  { %955 = vmatpush.bf16.msrb.mxu3 %v2671_v58  ;;  %981 = vmatpush.bf16.msrb.mxu1 %v2685_v8 }
 0x1c1   :  { %2211 = vmatmul.msk.bf16.vlgmr.msrb.gmra.mxu2 %vm304_vm0, %v2869_v39  ;;  %2212 = vmatmul.msk.bf16.vlgmr.msrb.gmra.mxu0 %vm304_vm0, %v2869_v39 }
 0x1c3   :  { %904 = vmatpush.bf16.msra.mxu2 %v2679_v1  ;;  %930 = vmatpush.bf16.msra.mxu0 %v2688_v12 }
 0x1c4   :  { %956 = vmatpush.bf16.msrb.mxu3 %v2683_v7  ;;  %982 = vmatpush.bf16.msrb.mxu1 %v2697_v27 }
 0x1c7   :  { %905 = vmatpush.bf16.msra.mxu2 %v2691_v19  ;;  %931 = vmatpush.bf16.msra.mxu0 %v2700_v31 }
 0x1c8   :  { %957 = vmatpush.bf16.msrb.mxu3 %v2695_v26  ;;  %983 = vmatpush.bf16.msrb.mxu1 %v2711_v48 }
 0x1cb   :  { %906 = vmatpush.bf16.msra.mxu2 %v2705_v37  ;;  %932 = vmatpush.bf16.msra.mxu0 %v2714_v52 }
 0x1cc   :  { %958 = vmatpush.bf16.msrb.mxu3 %v2709_v46  ;;  %984 = vmatpush.bf16.msrb.mxu1 %v2725_v0 }
 0x1cf   :  { %907 = vmatpush.bf16.msra.mxu2 %v2717_v56  ;;  %933 = vmatpush.bf16.msra.mxu0 %v2728_v2 }
 0x1d0   :  { %959 = vmatpush.bf16.msrb.mxu3 %v2723_v63  ;;  %985 = vmatpush.bf16.msrb.mxu1 %v2736_v11 }
 0x1d3   :  { %972 = vmatpush.bf16.msrb.mxu2 %v2635_v23  ;;  %998 = vmatpush.bf16.msrb.mxu0 %v2719_v62 }
 0x1ee   :  { %v755_v20 = vpop.f32.mrf.mxu1 }
 0x1f4   :  { %v729_v15 = vpop.f32.mrf.mxu3 }
 0x1f6   :  { %v757_v39 = vpop.f32.mrf.mxu1 }
 0x1fc   :  { %v731_v41 = vpop.f32.mrf.mxu3 }
 0x22e   :  { %v742_v32 = vpop.f32.mrf.mxu0 }
 0x22f   :  { %v743_v54 = vadd.f32 %v742_v32, %v3374_v50  ;;  %v794_v53 = vpop.f32.mrf.mxu1 }
 0x230   :  { %v795_v44 = vadd.f32 %v794_v53, %v3380_v60 }
 0x231   :  { %v756_v55 = vadd.f32 %v755_v20, %v743_v54 }
 0x233   :  { %v2214_v36 = vmul.f32 -1.442695, %v756_v55 }
 0x234   :  { %v716_v30 = vpop.f32.mrf.mxu2 }
 0x235   :  { %v717_v21 = vadd.f32 %v716_v30, %v3375_v40  ;;  %v768_v4 = vpop.f32.mrf.mxu3  ;;  %2356 = vpow2.f32 %v2214_v36  ;;  %v3382_v30 = vld [vmem:[#allocation12_spill] sm:$0xff] }
 0x236   :  { %v744_v35 = vpop.f32.mrf.mxu0  ;;  %v769_v20 = vadd.f32 %v768_v4, %v3381_v17 }
 0x237   :  { %v730_v16 = vadd.f32 %v729_v15, %v717_v21  ;;  %v796_v10 = vpop.f32.mrf.mxu1  ;;  %v2930_v15 = vpop.permute.xlu1 %895  ;;  %v3383_v21 = vld [vmem:[#allocation13_spill] sm:$0xff] }
 0x238   :  { %2218 = vmatmul.msk.bf16.vlgmr.msra.gmra.mxu3 %vm304_vm0, %v2930_v15  ;;  %2219 = vmatmul.msk.bf16.vlgmr.msra.gmra.mxu1 %vm304_vm0, %v2930_v15 }
 0x239   :  { %v2213_v57 = vmul.f32 -1.442695, %v730_v16  ;;  %1113 = vmatpush.bf16.msra.mxu3 %v3382_v30  ;;  %1139 = vmatpush.bf16.msra.mxu1 %v3383_v21 }
 0x23b   :  { %2358 = vpow2.f32 %v2213_v57  ;;  %v2357_v25 = vpop.eup %2356 }
 0x23c   :  { %v718_v13 = vpop.f32.mrf.mxu2  ;;  %v2927_v22 = vadd.f32 1.0, %v2357_v25 }
 0x23d   :  { %v770_v6 = vpop.f32.mrf.mxu3 }
 0x23e   :  { %v807_v45 = vpop.f32.mrf.mxu0  ;;  %2360 = vrcp.f32 %v2927_v22  ;;  %vm847_vm9 = vweird.f32 %v2927_v22 }
 0x23f   :  { %v808_v9 = vadd.f32 %v807_v45, %v795_v44 }
 0x241   :  { %v2359_v49 = vpop.eup %2358  ;;  %v2216_v39 = vmul.f32 -1.442695, %v808_v9 }
 0x242   :  { %v2932_v54 = vadd.f32 1.0, %v2359_v49 }
 0x243   :  { %2362 = vpow2.f32 %v2216_v39 }
 0x244   :  { %v781_v41 = vpop.f32.mrf.mxu2  ;;  %v2361_v36 = vpop.eup %2360  ;;  %vm832_vm13 = vweird.f32 %v2932_v54 }
 0x245   :  { %v782_v32 = vadd.f32 %v781_v41, %v769_v20  ;;  %v843_v13 = vmul.f32 %v2361_v36, %v2927_v22  ;;  %vm848_vm7 = vweird.f32 %v2361_v36 }
 0x246   :  { %v809_v55 = vpop.f32.mrf.mxu0  ;;  %vm2947_vm10 = vmor %vm847_vm9, %vm848_vm7 }
 0x247   :  { %v2215_v53 = vmul.f32 -1.442695, %v782_v32  ;;  %v844_v45 = vsub.f32 1.0, %v843_v13  ;;  %v853_v13 = vand.u32 2147483648, %v2927_v22 }
 0x249   :  { %2364 = vpow2.f32 %v2215_v53  ;;  %v2363_v35 = vpop.eup %2362  ;;  %v845_v49 = vmul.f32 %v2361_v36, %v844_v45  ;;  %v854_v17 = vor.u32 1.1754944e-38, %v853_v13 }
 0x24a   :  { %2366 = vrcp.f32 %v2932_v54  ;;  %v826_v6 = vadd.f32 1.0, %v2363_v35  ;;  %v851_v35 = vand.u32 2147483647, %v2927_v22  ;;  %v836_v22 = vand.u32 2147483647, %v2932_v54 }
 0x24b   :  { %v846_v53 = vadd.f32 %v2361_v36, %v845_v49  ;;  %v838_v49 = vand.u32 2147483648, %v2932_v54 }
 0x24c   :  { %v783_v4 = vpop.f32.mrf.mxu2  ;;  %vm852_vm2 = vcmp.eq.f32.partialorder %v851_v35, 8.507059e+37  ;;  %vm837_vm3 = vcmp.eq.f32.partialorder %v836_v22, 8.507059e+37  ;;  %vm877_vm5 = vweird.f32 %v826_v6  ;;  %v3388_v35 = vld [vmem:[#allocation18_spill] sm:$0xff] }
 0x24d   :  { %v839_v40 = vor.u32 1.1754944e-38, %v838_v49 }
 0x24f   :  { %v2365_v16 = vpop.eup %2364 }
 0x250   :  { %v2367_v10 = vpop.eup %2366  ;;  %v825_v57 = vadd.f32 1.0, %v2365_v16 }
 0x251   :  { %v828_v44 = vmul.f32 %v2367_v10, %v2932_v54  ;;  %vm833_vm11 = vweird.f32 %v2367_v10 }
 0x252   :  { %2368 = vrcp.f32 %v825_v57  ;;  %v868_v55 = vand.u32 2147483648, %v825_v57  ;;  %v866_v16 = vand.u32 2147483647, %v825_v57  ;;  %vm862_vm12 = vweird.f32 %v825_v57  ;;  %vm834_vm1 = vmor %vm832_vm13, %vm833_vm11 }
 0x253   :  { %2370 = vrcp.f32 %v826_v6  ;;  %v829_v25 = vsub.f32 1.0, %v828_v44 }
 0x254   :  { %vm867_vm15 = vcmp.eq.f32.partialorder %v866_v16, 8.507059e+37 }
 0x255   :  { %v830_v41 = vmul.f32 %v2367_v10, %v829_v25 }
 0x257   :  { %v831_v45 = vadd.f32 %v2367_v10, %v830_v41 }
 0x258   :  { %v2369_v9 = vpop.eup %2368 }
 0x259   :  { %v858_v20 = vmul.f32 %v2369_v9, %v825_v57  ;;  %v2371_v39 = vpop.eup %2370  ;;  %vm863_vm8 = vweird.f32 %v2369_v9 }
 0x25a   :  { %v873_v21 = vmul.f32 %v2371_v39, %v826_v6  ;;  %vm864_vm14 = vmor %vm862_vm12, %vm863_vm8  ;;  %vm878_vm4 = vweird.f32 %v2371_v39 }
 0x25b   :  { %v859_v32 = vsub.f32 1.0, %v858_v20  ;;  %v869_v20 = vor.u32 1.1754944e-38, %v868_v55  ;;  %vm879_vm6 = vmor %vm877_vm5, %vm878_vm4 }
 0x25c   :  { %v874_v60 = vsub.f32 1.0, %v873_v21 }
 0x25d   :  { %v860_v4 = vmul.f32 %v2369_v9, %v859_v32  ;;  %v850_v32 = vsel %vm2947_vm10, %v2361_v36, %v846_v53 }
 0x25e   :  { %v855_v50 = vsel %vm852_vm2, %v854_v17, %v850_v32  ;;  %v875_v55 = vmul.f32 %v2371_v39, %v874_v60 }
 0x25f   :  { %v861_v25 = vadd.f32 %v2369_v9, %v860_v4  ;;  %v835_v4 = vsel %vm834_vm1, %v2367_v10, %v831_v45  ;;  %v889_v44 = vmul.f32 %v855_v50, %v2881_v3 }
 0x260   :  { %v840_v62 = vsel %vm837_vm3, %v839_v40, %v835_v4  ;;  %v876_v54 = vadd.f32 %v2371_v39, %v875_v55 }
 0x261   :  { %v865_v30 = vsel %vm864_vm14, %v2369_v9, %v861_v25  ;;  %v883_v9 = vand.u32 2147483648, %v826_v6 }
 0x262   :  { %v870_v41 = vsel %vm867_vm15, %v869_v20, %v865_v30  ;;  %v881_v30 = vand.u32 2147483647, %v826_v6  ;;  %v880_v21 = vsel %vm879_vm6, %v2371_v39, %v876_v54  ;;  %v3389_v20 = vld [vmem:[#allocation16_spill] sm:$0xff] }
 0x263   :  { %v887_v57 = vmul.f32 2.0, %v870_v41  ;;  %v884_v10 = vor.u32 1.1754944e-38, %v883_v9  ;;  %v3390_v9 = vld [vmem:[#allocation19_spill] sm:$0xff] }
 0x264   :  { %vm882_vm7 = vcmp.eq.f32.partialorder %v881_v30, 8.507059e+37 }
 0x265   :  { %v2217_v28 = vadd.f32 -1.0, %v887_v57  ;;  %v885_v16 = vsel %vm882_vm7, %v884_v10, %v880_v21 }
 0x267   :  { %v890_v36 = vmul.f32 %v2217_v28, %v840_v62  ;;  %v3386_v28 = vld [vmem:[#allocation15_spill] sm:$0xff] }
 0x269   :  { %v2957_v53 = vadd.f32 %v890_v36, %v889_v44 }
 0x26b   :  { %2372 = vtanh.f32 %v2957_v53 }
 0x271   :  { %v2373_v17 = vpop.eup %2372 }
 0x272   :  { %v893_v40 = vmul.f32 %v2373_v17, %v885_v16 }
 0x274   :  { %v894_v60 = vpack.c.bf16 %v893_v40, %v893_v40 }
 0x276   :  { %908 = vmatmul.bf16.vlgmr.msra.gmra.mxu2 %v894_v60  ;;  %934 = vmatmul.bf16.vlgmr.msra.gmra.mxu0 %v894_v60 }
 0x277   :  { %960 = vmatmul.bf16.vlgmr.msrb.gmra.mxu3 %v894_v60  ;;  %986 = vmatmul.bf16.vlgmr.msrb.gmra.mxu1 %v894_v60  ;;  %v3391_v60 = vld [vmem:[#allocation17_spill] sm:$0xff] }
 0x278   :  { %1093 = vmatpush.bf16.msra.mxu2 %v2618_v5  ;;  %1119 = vmatpush.bf16.msra.mxu0 %v2631_v18 }
 0x279   :  { %1145 = vmatpush.bf16.msrb.mxu3 %v2625_v14  ;;  %1171 = vmatpush.bf16.msrb.mxu1 %v2647_v33 }
 0x27c   :  { %1094 = vmatpush.bf16.msra.mxu2 %v2637_v24  ;;  %1120 = vmatpush.bf16.msra.mxu0 %v2649_v34 }
 0x27d   :  { %1146 = vmatpush.bf16.msrb.mxu3 %v2642_v29  ;;  %1172 = vmatpush.bf16.msrb.mxu1 %v2660_v43 }
 0x280   :  { %1095 = vmatpush.bf16.msra.mxu2 %v2652_v38  ;;  %1121 = vmatpush.bf16.msra.mxu0 %v2663_v47 }
 0x281   :  { %1147 = vmatpush.bf16.msrb.mxu3 %v2658_v42  ;;  %1173 = vmatpush.bf16.msrb.mxu1 %v2673_v59 }
 0x284   :  { %1096 = vmatpush.bf16.msra.mxu2 %v2667_v51  ;;  %1122 = vmatpush.bf16.msra.mxu0 %v2676_v61 }
 0x285   :  { %1148 = vmatpush.bf16.msrb.mxu3 %v2671_v58  ;;  %1174 = vmatpush.bf16.msrb.mxu1 %v2685_v8 }
 0x286   :  { %2220 = vmatmul.msk.bf16.vlgmr.msrb.gmra.mxu2 %vm304_vm0, %v2930_v15  ;;  %2221 = vmatmul.msk.bf16.vlgmr.msrb.gmra.mxu0 %vm304_vm0, %v2930_v15  ;;  %v3387_v15 = vld [vmem:[#allocation14_spill] sm:$0xff] }
 0x287   :  { %1281 = vrot.lane.b32.xlu2 %v3387_v15, %s2573_s12 }
 0x288   :  { %1097 = vmatpush.bf16.msra.mxu2 %v2679_v1  ;;  %1123 = vmatpush.bf16.msra.mxu0 %v2688_v12 }
 0x289   :  { %1149 = vmatpush.bf16.msrb.mxu3 %v2683_v7  ;;  %1175 = vmatpush.bf16.msrb.mxu1 %v2697_v27 }
 0x28c   :  { %1098 = vmatpush.bf16.msra.mxu2 %v2691_v19  ;;  %1124 = vmatpush.bf16.msra.mxu0 %v2700_v31 }
 0x28d   :  { %1150 = vmatpush.bf16.msrb.mxu3 %v2695_v26  ;;  %1176 = vmatpush.bf16.msrb.mxu1 %v2711_v48 }
 0x290   :  { %1099 = vmatpush.bf16.msra.mxu2 %v2705_v37  ;;  %1125 = vmatpush.bf16.msra.mxu0 %v2714_v52 }
 0x291   :  { %1151 = vmatpush.bf16.msrb.mxu3 %v2709_v46  ;;  %1177 = vmatpush.bf16.msrb.mxu1 %v2725_v0 }
 0x294   :  { %1100 = vmatpush.bf16.msra.mxu2 %v2717_v56  ;;  %1126 = vmatpush.bf16.msra.mxu0 %v2728_v2 }
 0x295   :  { %1152 = vmatpush.bf16.msrb.mxu3 %v2723_v63  ;;  %1178 = vmatpush.bf16.msrb.mxu1 %v2736_v11 }
 0x298   :  { %1165 = vmatpush.bf16.msrb.mxu2 %v2635_v23  ;;  %1191 = vmatpush.bf16.msrb.mxu0 %v3386_v28 }
 0x2b5   :  { %v948_v62 = vpop.f32.mrf.mxu1 }
 0x2bb   :  { %v922_v50 = vpop.f32.mrf.mxu3 }
 0x2bd   :  { %v950_v3 = vpop.f32.mrf.mxu1 }
 0x2c3   :  { %v924_v6 = vpop.f32.mrf.mxu3 }
 0x2f3   :  { %v935_v39 = vpop.f32.mrf.mxu0 }
 0x2f4   :  { %v936_v13 = vadd.f32 %v935_v39, %v3388_v35  ;;  %v987_v45 = vpop.f32.mrf.mxu1 }
 0x2f5   :  { %v988_v30 = vadd.f32 %v987_v45, %v3390_v9 }
 0x2f6   :  { %v949_v25 = vadd.f32 %v948_v62, %v936_v13 }
 0x2f8   :  { %v2223_v41 = vmul.f32 -1.442695, %v949_v25 }
 0x2f9   :  { %v909_v49 = vpop.f32.mrf.mxu2 }
 0x2fa   :  { %v910_v32 = vadd.f32 %v909_v49, %v3389_v20  ;;  %v961_v22 = vpop.f32.mrf.mxu3  ;;  %2374 = vpow2.f32 %v2223_v41  ;;  %v3392_v49 = vld [vmem:[#allocation12_spill] sm:$0xff] }
 0x2fb   :  { %v937_v4 = vpop.f32.mrf.mxu0  ;;  %v962_v62 = vadd.f32 %v961_v22, %v3391_v60 }
 0x2fc   :  { %v923_v57 = vadd.f32 %v922_v50, %v910_v32  ;;  %v989_v55 = vpop.f32.mrf.mxu1  ;;  %v3005_v50 = vpop.permute.xlu1 %1088  ;;  %v3393_v32 = vld [vmem:[#allocation13_spill] sm:$0xff] }
 0x2fd   :  { %2227 = vmatmul.msk.bf16.vlgmr.msra.gmra.mxu3 %vm304_vm0, %v3005_v50  ;;  %2228 = vmatmul.msk.bf16.vlgmr.msra.gmra.mxu1 %vm304_vm0, %v3005_v50 }
 0x2fe   :  { %v2222_v44 = vmul.f32 -1.442695, %v923_v57  ;;  %1306 = vmatpush.bf16.msra.mxu3 %v3392_v49  ;;  %1332 = vmatpush.bf16.msra.mxu1 %v3393_v32 }
 0x300   :  { %2376 = vpow2.f32 %v2222_v44  ;;  %v2375_v10 = vpop.eup %2374 }
 0x301   :  { %v911_v36 = vpop.f32.mrf.mxu2  ;;  %v3002_v40 = vadd.f32 1.0, %v2375_v10 }
 0x302   :  { %v963_v54 = vpop.f32.mrf.mxu3 }
 0x303   :  { %v1000_v21 = vpop.f32.mrf.mxu0  ;;  %2378 = vrcp.f32 %v3002_v40  ;;  %vm1040_vm10 = vweird.f32 %v3002_v40 }
 0x304   :  { %v1001_v17 = vadd.f32 %v1000_v21, %v988_v30 }
 0x306   :  { %v2377_v16 = vpop.eup %2376  ;;  %v2225_v3 = vmul.f32 -1.442695, %v1001_v17 }
 0x307   :  { %v3007_v13 = vadd.f32 1.0, %v2377_v16 }
 0x308   :  { %2380 = vpow2.f32 %v2225_v3 }
 0x309   :  { %v974_v6 = vpop.f32.mrf.mxu2  ;;  %v2379_v41 = vpop.eup %2378  ;;  %vm1025_vm14 = vweird.f32 %v3007_v13 }
 0x30a   :  { %v975_v39 = vadd.f32 %v974_v6, %v962_v62  ;;  %v1036_v36 = vmul.f32 %v2379_v41, %v3002_v40  ;;  %vm1041_vm8 = vweird.f32 %v2379_v41 }
 0x30b   :  { %v1002_v25 = vpop.f32.mrf.mxu0  ;;  %vm3022_vm11 = vmor %vm1040_vm10, %vm1041_vm8 }
 0x30c   :  { %v2224_v45 = vmul.f32 -1.442695, %v975_v39  ;;  %v1037_v21 = vsub.f32 1.0, %v1036_v36  ;;  %v1046_v36 = vand.u32 2147483648, %v3002_v40 }
 0x30e   :  { %2382 = vpow2.f32 %v2224_v45  ;;  %v2381_v4 = vpop.eup %2380  ;;  %v1038_v16 = vmul.f32 %v2379_v41, %v1037_v21  ;;  %v1047_v60 = vor.u32 1.1754944e-38, %v1046_v36 }
 0x30f   :  { %2384 = vrcp.f32 %v3007_v13  ;;  %v1019_v54 = vadd.f32 1.0, %v2381_v4  ;;  %v1044_v4 = vand.u32 2147483647, %v3002_v40  ;;  %v1029_v40 = vand.u32 2147483647, %v3007_v13 }
 0x310   :  { %v1039_v45 = vadd.f32 %v2379_v41, %v1038_v16  ;;  %v1031_v16 = vand.u32 2147483648, %v3007_v13 }
 0x311   :  { %v976_v22 = vpop.f32.mrf.mxu2  ;;  %vm1045_vm3 = vcmp.eq.f32.partialorder %v1044_v4, 8.507059e+37  ;;  %vm1030_vm4 = vcmp.eq.f32.partialorder %v1029_v40, 8.507059e+37  ;;  %vm1070_vm6 = vweird.f32 %v1019_v54  ;;  %v3398_v4 = vld [vmem:[#allocation18_spill] sm:$0xff] }
 0x312   :  { %v1032_v20 = vor.u32 1.1754944e-38, %v1031_v16 }
 0x314   :  { %v2383_v57 = vpop.eup %2382 }
 0x315   :  { %v2385_v55 = vpop.eup %2384  ;;  %v1018_v44 = vadd.f32 1.0, %v2383_v57 }
 0x316   :  { %v1021_v30 = vmul.f32 %v2385_v55, %v3007_v13  ;;  %vm1026_vm12 = vweird.f32 %v2385_v55 }
 0x317   :  { %2386 = vrcp.f32 %v1018_v44  ;;  %v1061_v25 = vand.u32 2147483648, %v1018_v44  ;;  %v1059_v57 = vand.u32 2147483647, %v1018_v44  ;;  %vm1055_vm13 = vweird.f32 %v1018_v44  ;;  %vm1027_vm2 = vmor %vm1025_vm14, %vm1026_vm12 }
 0x318   :  { %2388 = vrcp.f32 %v1019_v54  ;;  %v1022_v10 = vsub.f32 1.0, %v1021_v30 }
 0x319   :  { %vm1060_vm1 = vcmp.eq.f32.partialorder %v1059_v57, 8.507059e+37 }
 0x31a   :  { %v1023_v6 = vmul.f32 %v2385_v55, %v1022_v10 }
 0x31c   :  { %v1024_v21 = vadd.f32 %v2385_v55, %v1023_v6 }
 0x31d   :  { %v2387_v17 = vpop.eup %2386 }
 0x31e   :  { %v1051_v62 = vmul.f32 %v2387_v17, %v1018_v44  ;;  %v2389_v3 = vpop.eup %2388  ;;  %vm1056_vm9 = vweird.f32 %v2387_v17 }
 0x31f   :  { %v1066_v32 = vmul.f32 %v2389_v3, %v1019_v54  ;;  %vm1057_vm15 = vmor %vm1055_vm13, %vm1056_vm9  ;;  %vm1071_vm5 = vweird.f32 %v2389_v3 }
 0x320   :  { %v1052_v39 = vsub.f32 1.0, %v1051_v62  ;;  %v1062_v62 = vor.u32 1.1754944e-38, %v1061_v25  ;;  %vm1072_vm7 = vmor %vm1070_vm6, %vm1071_vm5 }
 0x321   :  { %v1067_v9 = vsub.f32 1.0, %v1066_v32 }
 0x322   :  { %v1053_v22 = vmul.f32 %v2387_v17, %v1052_v39  ;;  %v1043_v39 = vsel %vm3022_vm11, %v2379_v41, %v1039_v45 }
 0x323   :  { %v1048_v35 = vsel %vm1045_vm3, %v1047_v60, %v1043_v39  ;;  %v1068_v25 = vmul.f32 %v2389_v3, %v1067_v9 }
 0x324   :  { %v1054_v10 = vadd.f32 %v2387_v17, %v1053_v22  ;;  %v1028_v22 = vsel %vm1027_vm2, %v2385_v55, %v1024_v21  ;;  %v1082_v30 = vmul.f32 %v1048_v35, %v2957_v53  ;;  %v3396_v53 = vld [vmem:[#allocation15_spill] sm:$0xff] }
 0x325   :  { %v1033_v28 = vsel %vm1030_vm4, %v1032_v20, %v1028_v22  ;;  %v1069_v13 = vadd.f32 %v2389_v3, %v1068_v25 }
 0x326   :  { %v1058_v49 = vsel %vm1057_vm15, %v2387_v17, %v1054_v10  ;;  %v1076_v17 = vand.u32 2147483648, %v1019_v54 }
 0x327   :  { %v1063_v6 = vsel %vm1060_vm1, %v1062_v62, %v1058_v49  ;;  %v1074_v49 = vand.u32 2147483647, %v1019_v54  ;;  %v1073_v32 = vsel %vm1072_vm7, %v2389_v3, %v1069_v13  ;;  %v3399_v62 = vld [vmem:[#allocation16_spill] sm:$0xff] }
 0x328   :  { %v1080_v44 = vmul.f32 2.0, %v1063_v6  ;;  %v1077_v55 = vor.u32 1.1754944e-38, %v1076_v17  ;;  %v3400_v17 = vld [vmem:[#allocation19_spill] sm:$0xff] }
 0x329   :  { %vm1075_vm8 = vcmp.eq.f32.partialorder %v1074_v49, 8.507059e+37 }
 0x32a   :  { %v2226_v15 = vadd.f32 -1.0, %v1080_v44  ;;  %v1078_v57 = vsel %vm1075_vm8, %v1077_v55, %v1073_v32 }
 0x32c   :  { %v1083_v41 = vmul.f32 %v2226_v15, %v1033_v28 }
 0x32e   :  { %v3032_v45 = vadd.f32 %v1083_v41, %v1082_v30 }
 0x330   :  { %2390 = vtanh.f32 %v3032_v45 }
 0x336   :  { %v2391_v60 = vpop.eup %2390 }
 0x337   :  { %v1086_v20 = vmul.f32 %v2391_v60, %v1078_v57 }
 0x339   :  { %v1087_v9 = vpack.c.bf16 %v1086_v20, %v1086_v20 }
 0x33b   :  { %1101 = vmatmul.bf16.vlgmr.msra.gmra.mxu2 %v1087_v9  ;;  %1127 = vmatmul.bf16.vlgmr.msra.gmra.mxu0 %v1087_v9 }
 0x33c   :  { %1153 = vmatmul.bf16.vlgmr.msrb.gmra.mxu3 %v1087_v9  ;;  %1179 = vmatmul.bf16.vlgmr.msrb.gmra.mxu1 %v1087_v9  ;;  %v3401_v9 = vld [vmem:[#allocation17_spill] sm:$0xff] }
 0x33d   :  { %1286 = vmatpush.bf16.msra.mxu2 %v2618_v5  ;;  %1312 = vmatpush.bf16.msra.mxu0 %v2631_v18 }
 0x33e   :  { %1338 = vmatpush.bf16.msrb.mxu3 %v2625_v14  ;;  %1364 = vmatpush.bf16.msrb.mxu1 %v2647_v33 }
 0x341   :  { %1287 = vmatpush.bf16.msra.mxu2 %v2637_v24  ;;  %1313 = vmatpush.bf16.msra.mxu0 %v2649_v34 }
 0x342   :  { %1339 = vmatpush.bf16.msrb.mxu3 %v2642_v29  ;;  %1365 = vmatpush.bf16.msrb.mxu1 %v2660_v43 }
 0x345   :  { %1288 = vmatpush.bf16.msra.mxu2 %v2652_v38  ;;  %1314 = vmatpush.bf16.msra.mxu0 %v2663_v47 }
 0x346   :  { %1340 = vmatpush.bf16.msrb.mxu3 %v2658_v42  ;;  %1366 = vmatpush.bf16.msrb.mxu1 %v2673_v59 }
 0x349   :  { %1289 = vmatpush.bf16.msra.mxu2 %v2667_v51  ;;  %1315 = vmatpush.bf16.msra.mxu0 %v2676_v61 }
 0x34a   :  { %1341 = vmatpush.bf16.msrb.mxu3 %v2671_v58  ;;  %1367 = vmatpush.bf16.msrb.mxu1 %v2685_v8 }
 0x34b   :  { %2229 = vmatmul.msk.bf16.vlgmr.msrb.gmra.mxu2 %vm304_vm0, %v3005_v50  ;;  %2230 = vmatmul.msk.bf16.vlgmr.msrb.gmra.mxu0 %vm304_vm0, %v3005_v50  ;;  %v3397_v50 = vld [vmem:[#allocation14_spill] sm:$0xff] }
 0x34c   :  { %1474 = vrot.lane.b32.xlu2 %v3397_v50, %s2574_s13 }
 0x34d   :  { %1290 = vmatpush.bf16.msra.mxu2 %v2679_v1  ;;  %1316 = vmatpush.bf16.msra.mxu0 %v2688_v12 }
 0x34e   :  { %1342 = vmatpush.bf16.msrb.mxu3 %v2683_v7  ;;  %1368 = vmatpush.bf16.msrb.mxu1 %v2697_v27 }
 0x351   :  { %1291 = vmatpush.bf16.msra.mxu2 %v2691_v19  ;;  %1317 = vmatpush.bf16.msra.mxu0 %v2700_v31 }
 0x352   :  { %1343 = vmatpush.bf16.msrb.mxu3 %v2695_v26  ;;  %1369 = vmatpush.bf16.msrb.mxu1 %v2711_v48 }
 0x355   :  { %1292 = vmatpush.bf16.msra.mxu2 %v2705_v37  ;;  %1318 = vmatpush.bf16.msra.mxu0 %v2714_v52 }
 0x356   :  { %1344 = vmatpush.bf16.msrb.mxu3 %v2709_v46  ;;  %1370 = vmatpush.bf16.msrb.mxu1 %v2725_v0 }
 0x359   :  { %1293 = vmatpush.bf16.msra.mxu2 %v2717_v56  ;;  %1319 = vmatpush.bf16.msra.mxu0 %v2728_v2 }
 0x35a   :  { %1345 = vmatpush.bf16.msrb.mxu3 %v2723_v63  ;;  %1371 = vmatpush.bf16.msrb.mxu1 %v2736_v11 }
 0x35d   :  { %1358 = vmatpush.bf16.msrb.mxu2 %v2635_v23  ;;  %1384 = vmatpush.bf16.msrb.mxu0 %v3396_v53 }
 0x37a   :  { %v1141_v28 = vpop.f32.mrf.mxu1 }
 0x380   :  { %v1115_v15 = vpop.f32.mrf.mxu3 }
 0x382   :  { %v1143_v35 = vpop.f32.mrf.mxu1 }
 0x388   :  { %v1117_v54 = vpop.f32.mrf.mxu3 }
 0x3b8   :  { %v1128_v3 = vpop.f32.mrf.mxu0 }
 0x3b9   :  { %v1129_v36 = vadd.f32 %v1128_v3, %v3398_v4  ;;  %v1180_v21 = vpop.f32.mrf.mxu1 }
 0x3ba   :  { %v1181_v49 = vadd.f32 %v1180_v21, %v3400_v17 }
 0x3bb   :  { %v1142_v10 = vadd.f32 %v1141_v28, %v1129_v36 }
 0x3bd   :  { %v2232_v6 = vmul.f32 -1.442695, %v1142_v10  ;;  %v3402_v10 = vld [vmem:[#allocation12_spill] sm:$0xff] }
 0x3be   :  { %v1102_v16 = vpop.f32.mrf.mxu2 }
 0x3bf   :  { %v1103_v39 = vadd.f32 %v1102_v16, %v3399_v62  ;;  %v1154_v40 = vpop.f32.mrf.mxu3  ;;  %2392 = vpow2.f32 %v2232_v6  ;;  %v3403_v16 = vld [vmem:[#allocation13_spill] sm:$0xff] }
 0x3c0   :  { %v1130_v22 = vpop.f32.mrf.mxu0  ;;  %v1155_v28 = vadd.f32 %v1154_v40, %v3401_v9 }
 0x3c1   :  { %v1116_v44 = vadd.f32 %v1115_v15, %v1103_v39  ;;  %v1182_v25 = vpop.f32.mrf.mxu1  ;;  %v3080_v15 = vpop.permute.xlu2 %1281 }
 0x3c2   :  { %2236 = vmatmul.msk.bf16.vlgmr.msra.gmra.mxu3 %vm304_vm0, %v3080_v15  ;;  %2237 = vmatmul.msk.bf16.vlgmr.msra.gmra.mxu1 %vm304_vm0, %v3080_v15 }
 0x3c3   :  { %v2231_v30 = vmul.f32 -1.442695, %v1116_v44  ;;  %1499 = vmatpush.bf16.msra.mxu3 %v3402_v10  ;;  %1525 = vmatpush.bf16.msra.mxu1 %v3403_v16 }
 0x3c5   :  { %2394 = vpow2.f32 %v2231_v30  ;;  %v2393_v55 = vpop.eup %2392 }
 0x3c6   :  { %v1104_v41 = vpop.f32.mrf.mxu2  ;;  %v3077_v20 = vadd.f32 1.0, %v2393_v55 }
 0x3c7   :  { %v1156_v13 = vpop.f32.mrf.mxu3 }
 0x3c8   :  { %v1193_v32 = vpop.f32.mrf.mxu0  ;;  %2396 = vrcp.f32 %v3077_v20  ;;  %vm1233_vm11 = vweird.f32 %v3077_v20 }
 0x3c9   :  { %v1194_v60 = vadd.f32 %v1193_v32, %v1181_v49 }
 0x3cb   :  { %v2395_v57 = vpop.eup %2394  ;;  %v2234_v35 = vmul.f32 -1.442695, %v1194_v60 }
 0x3cc   :  { %v3082_v3 = vadd.f32 1.0, %v2395_v57 }
 0x3cd   :  { %2398 = vpow2.f32 %v2234_v35 }
 0x3ce   :  { %v1167_v50 = vpop.f32.mrf.mxu2  ;;  %v2397_v40 = vpop.eup %2396  ;;  %vm1218_vm15 = vweird.f32 %v3082_v3 }
 0x3cf   :  { %v1168_v54 = vadd.f32 %v1167_v50, %v1155_v28  ;;  %v1229_v30 = vmul.f32 %v2397_v40, %v3077_v20  ;;  %vm1234_vm9 = vweird.f32 %v2397_v40 }
 0x3d0   :  { %v1195_v36 = vpop.f32.mrf.mxu0  ;;  %vm3097_vm12 = vmor %vm1233_vm11, %vm1234_vm9 }
 0x3d1   :  { %v2233_v21 = vmul.f32 -1.442695, %v1168_v54  ;;  %v1230_v49 = vsub.f32 1.0, %v1229_v30 }
 0x3d3   :  { %2400 = vpow2.f32 %v2233_v21  ;;  %v2399_v6 = vpop.eup %2398  ;;  %v1231_v60 = vmul.f32 %v2397_v40, %v1230_v49 }
 0x3d4   :  { %2402 = vrcp.f32 %v3082_v3  ;;  %v1212_v41 = vadd.f32 1.0, %v2399_v6  ;;  %v1237_v6 = vand.u32 2147483647, %v3077_v20 }
 0x3d5   :  { %v1232_v36 = vadd.f32 %v2397_v40, %v1231_v60  ;;  %v1224_v60 = vand.u32 2147483648, %v3082_v3 }
 0x3d6   :  { %v1169_v39 = vpop.f32.mrf.mxu2  ;;  %vm1238_vm4 = vcmp.eq.f32.partialorder %v1237_v6, 8.507059e+37  ;;  %vm1263_vm7 = vweird.f32 %v1212_v41 }
 0x3d7   :  { %v1225_v17 = vor.u32 1.1754944e-38, %v1224_v60  ;;  %v3408_v60 = vld [vmem:[#allocation16_spill] sm:$0xff] }
 0x3d9   :  { %v2401_v22 = vpop.eup %2400 }
 0x3da   :  { %v2403_v44 = vpop.eup %2402  ;;  %v1211_v25 = vadd.f32 1.0, %v2401_v22  ;;  %v1239_v22 = vand.u32 2147483648, %v3077_v20  ;;  %v1222_v20 = vand.u32 2147483647, %v3082_v3 }
 0x3db   :  { %v1214_v13 = vmul.f32 %v2403_v44, %v3082_v3  ;;  %vm1219_vm13 = vweird.f32 %v2403_v44 }
 0x3dc   :  { %2404 = vrcp.f32 %v1211_v25  ;;  %v1254_v54 = vand.u32 2147483648, %v1211_v25  ;;  %v1252_v39 = vand.u32 2147483647, %v1211_v25  ;;  %vm1248_vm14 = vweird.f32 %v1211_v25  ;;  %vm1220_vm3 = vmor %vm1218_vm15, %vm1219_vm13 }
 0x3dd   :  { %2406 = vrcp.f32 %v1212_v41  ;;  %v1215_v32 = vsub.f32 1.0, %v1214_v13  ;;  %v1240_v10 = vor.u32 1.1754944e-38, %v1239_v22  ;;  %vm1223_vm5 = vcmp.eq.f32.partialorder %v1222_v20, 8.507059e+37 }
 0x3de   :  { %vm1253_vm2 = vcmp.eq.f32.partialorder %v1252_v39, 8.507059e+37 }
 0x3df   :  { %v1216_v35 = vmul.f32 %v2403_v44, %v1215_v32 }
 0x3e1   :  { %v1217_v49 = vadd.f32 %v2403_v44, %v1216_v35 }
 0x3e2   :  { %v2405_v55 = vpop.eup %2404 }
 0x3e3   :  { %v1244_v57 = vmul.f32 %v2405_v55, %v1211_v25  ;;  %v2407_v28 = vpop.eup %2406  ;;  %vm1249_vm10 = vweird.f32 %v2405_v55 }
 0x3e4   :  { %v1259_v30 = vmul.f32 %v2407_v28, %v1212_v41  ;;  %vm1250_vm1 = vmor %vm1248_vm14, %vm1249_vm10  ;;  %vm1264_vm6 = vweird.f32 %v2407_v28 }
 0x3e5   :  { %v1245_v50 = vsub.f32 1.0, %v1244_v57  ;;  %v1255_v57 = vor.u32 1.1754944e-38, %v1254_v54  ;;  %vm1265_vm8 = vmor %vm1263_vm7, %vm1264_vm6 }
 0x3e6   :  { %v1260_v9 = vsub.f32 1.0, %v1259_v30 }
 0x3e7   :  { %v1246_v21 = vmul.f32 %v2405_v55, %v1245_v50  ;;  %v1236_v50 = vsel %vm3097_vm12, %v2397_v40, %v1232_v36 }
 0x3e8   :  { %v1241_v62 = vsel %vm1238_vm4, %v1240_v10, %v1236_v50  ;;  %v1261_v54 = vmul.f32 %v2407_v28, %v1260_v9 }
 0x3e9   :  { %v1247_v32 = vadd.f32 %v2405_v55, %v1246_v21  ;;  %v1221_v21 = vsel %vm1220_vm3, %v2403_v44, %v1217_v49  ;;  %v1275_v13 = vmul.f32 %v1241_v62, %v3032_v45  ;;  %v3406_v45 = vld [vmem:[#allocation15_spill] sm:$0xff] }
 0x3ea   :  { %v1226_v53 = vsel %vm1223_vm5, %v1225_v17, %v1221_v21  ;;  %v1262_v3 = vadd.f32 %v2407_v28, %v1261_v54 }
 0x3eb   :  { %v1251_v16 = vsel %vm1250_vm1, %v2405_v55, %v1247_v32  ;;  %v1269_v55 = vand.u32 2147483648, %v1212_v41 }
 0x3ec   :  { %v1256_v35 = vsel %vm1253_vm2, %v1255_v57, %v1251_v16  ;;  %v1267_v16 = vand.u32 2147483647, %v1212_v41  ;;  %v1266_v44 = vsel %vm1265_vm8, %v2407_v28, %v1262_v3  ;;  %v3407_v28 = vld [vmem:[#allocation18_spill] sm:$0xff]  ;;  %v3409_v3 = vld [vmem:[#allocation19_spill] sm:$0xff] }
 0x3ed   :  { %v1273_v25 = vmul.f32 2.0, %v1256_v35  ;;  %v1270_v39 = vor.u32 1.1754944e-38, %v1269_v55 }
 0x3ee   :  { %vm1268_vm9 = vcmp.eq.f32.partialorder %v1267_v16, 8.507059e+37 }
 0x3ef   :  { %v2235_v4 = vadd.f32 -1.0, %v1273_v25  ;;  %v1271_v6 = vsel %vm1268_vm9, %v1270_v39, %v1266_v44 }
 0x3f1   :  { %v1276_v40 = vmul.f32 %v2235_v4, %v1226_v53 }
 0x3f3   :  { %v3107_v36 = vadd.f32 %v1276_v40, %v1275_v13 }
 0x3f5   :  { %2408 = vtanh.f32 %v3107_v36 }
 0x3fb   :  { %v2409_v10 = vpop.eup %2408 }
 0x3fc   :  { %v1279_v17 = vmul.f32 %v2409_v10, %v1271_v6 }
 0x3fe   :  { %v1280_v9 = vpack.c.bf16 %v1279_v17, %v1279_v17  ;;  %v3410_v17 = vld [vmem:[#allocation17_spill] sm:$0xff] }
 0x400   :  { %1294 = vmatmul.bf16.vlgmr.msra.gmra.mxu2 %v1280_v9  ;;  %1320 = vmatmul.bf16.vlgmr.msra.gmra.mxu0 %v1280_v9 }
 0x401   :  { %1346 = vmatmul.bf16.vlgmr.msrb.gmra.mxu3 %v1280_v9  ;;  %1372 = vmatmul.bf16.vlgmr.msrb.gmra.mxu1 %v1280_v9 }
 0x402   :  { %1479 = vmatpush.bf16.msra.mxu2 %v2618_v5  ;;  %1505 = vmatpush.bf16.msra.mxu0 %v2631_v18 }
 0x403   :  { %1531 = vmatpush.bf16.msrb.mxu3 %v2625_v14  ;;  %1557 = vmatpush.bf16.msrb.mxu1 %v2647_v33 }
 0x406   :  { %1480 = vmatpush.bf16.msra.mxu2 %v2637_v24  ;;  %1506 = vmatpush.bf16.msra.mxu0 %v2649_v34 }
 0x407   :  { %1532 = vmatpush.bf16.msrb.mxu3 %v2642_v29  ;;  %1558 = vmatpush.bf16.msrb.mxu1 %v2660_v43 }
 0x40a   :  { %1481 = vmatpush.bf16.msra.mxu2 %v2652_v38  ;;  %1507 = vmatpush.bf16.msra.mxu0 %v2663_v47 }
 0x40b   :  { %1533 = vmatpush.bf16.msrb.mxu3 %v2658_v42  ;;  %1559 = vmatpush.bf16.msrb.mxu1 %v2673_v59 }
 0x40e   :  { %1482 = vmatpush.bf16.msra.mxu2 %v2667_v51  ;;  %1508 = vmatpush.bf16.msra.mxu0 %v2676_v61 }
 0x40f   :  { %1534 = vmatpush.bf16.msrb.mxu3 %v2671_v58  ;;  %1560 = vmatpush.bf16.msrb.mxu1 %v2685_v8 }
 0x410   :  { %2238 = vmatmul.msk.bf16.vlgmr.msrb.gmra.mxu2 %vm304_vm0, %v3080_v15  ;;  %2239 = vmatmul.msk.bf16.vlgmr.msrb.gmra.mxu0 %vm304_vm0, %v3080_v15 }
 0x412   :  { %1483 = vmatpush.bf16.msra.mxu2 %v2679_v1  ;;  %1509 = vmatpush.bf16.msra.mxu0 %v2688_v12 }
 0x413   :  { %1535 = vmatpush.bf16.msrb.mxu3 %v2683_v7  ;;  %1561 = vmatpush.bf16.msrb.mxu1 %v2697_v27 }
 0x416   :  { %1484 = vmatpush.bf16.msra.mxu2 %v2691_v19  ;;  %1510 = vmatpush.bf16.msra.mxu0 %v2700_v31 }
 0x417   :  { %1536 = vmatpush.bf16.msrb.mxu3 %v2695_v26  ;;  %1562 = vmatpush.bf16.msrb.mxu1 %v2711_v48 }
 0x41a   :  { %1485 = vmatpush.bf16.msra.mxu2 %v2705_v37  ;;  %1511 = vmatpush.bf16.msra.mxu0 %v2714_v52 }
 0x41b   :  { %1537 = vmatpush.bf16.msrb.mxu3 %v2709_v46  ;;  %1563 = vmatpush.bf16.msrb.mxu1 %v2725_v0 }
 0x41e   :  { %1486 = vmatpush.bf16.msra.mxu2 %v2717_v56  ;;  %1512 = vmatpush.bf16.msra.mxu0 %v2728_v2 }
 0x41f   :  { %1538 = vmatpush.bf16.msrb.mxu3 %v2723_v63  ;;  %1564 = vmatpush.bf16.msrb.mxu1 %v2736_v11 }
 0x422   :  { %1551 = vmatpush.bf16.msrb.mxu2 %v2635_v23  ;;  %1577 = vmatpush.bf16.msrb.mxu0 %v3406_v45 }
 0x43f   :  { %v1334_v53 = vpop.f32.mrf.mxu1 }
 0x445   :  { %v1308_v4 = vpop.f32.mrf.mxu3 }
 0x447   :  { %v1336_v62 = vpop.f32.mrf.mxu1 }
 0x44d   :  { %v1310_v15 = vpop.f32.mrf.mxu3 }
 0x47d   :  { %v1321_v41 = vpop.f32.mrf.mxu0 }
 0x47e   :  { %v1322_v22 = vadd.f32 %v1321_v41, %v3407_v28  ;;  %v1373_v30 = vpop.f32.mrf.mxu1 }
 0x47f   :  { %v1374_v55 = vadd.f32 %v1373_v30, %v3409_v3  ;;  %v3411_v30 = vld [vmem:[#allocation12_spill] sm:$0xff] }
 0x480   :  { %v1335_v49 = vadd.f32 %v1334_v53, %v1322_v22  ;;  %v3156_v22 = vpop.permute.xlu2 %1474 }
 0x481   :  { %2245 = vmatmul.msk.bf16.vlgmr.msra.gmra.mxu3 %vm304_vm0, %v3156_v22  ;;  %2246 = vmatmul.msk.bf16.vlgmr.msra.gmra.mxu1 %vm304_vm0, %v3156_v22 }
 0x482   :  { %v2241_v20 = vmul.f32 -1.442695, %v1335_v49  ;;  %1692 = vmatpush.bf16.msra.mxu3 %v3411_v30 }
 0x483   :  { %v1295_v32 = vpop.f32.mrf.mxu2 }
 0x484   :  { %v1296_v57 = vadd.f32 %v1295_v32, %v3408_v60  ;;  %v1347_v50 = vpop.f32.mrf.mxu3  ;;  %2410 = vpow2.f32 %v2241_v20  ;;  %v3412_v32 = vld [vmem:[#allocation13_spill] sm:$0xff] }
 0x485   :  { %v1323_v35 = vpop.f32.mrf.mxu0  ;;  %v1348_v9 = vadd.f32 %v1347_v50, %v3410_v17  ;;  %1718 = vmatpush.bf16.msra.mxu1 %v3412_v32 }
 0x486   :  { %v1309_v21 = vadd.f32 %v1308_v4, %v1296_v57  ;;  %v1375_v25 = vpop.f32.mrf.mxu1 }
 0x488   :  { %v2240_v54 = vmul.f32 -1.442695, %v1309_v21 }
 0x48a   :  { %2412 = vpow2.f32 %v2240_v54  ;;  %v2411_v44 = vpop.eup %2410 }
 0x48b   :  { %v1297_v13 = vpop.f32.mrf.mxu2  ;;  %v3151_v6 = vadd.f32 1.0, %v2411_v44 }
 0x48c   :  { %v1349_v40 = vpop.f32.mrf.mxu3 }
 0x48d   :  { %v1386_v16 = vpop.f32.mrf.mxu0  ;;  %2414 = vrcp.f32 %v3151_v6  ;;  %vm1426_vm12 = vweird.f32 %v3151_v6  ;;  %v1430_v32 = vand.u32 2147483647, %v3151_v6 }
 0x48e   :  { %v1387_v39 = vadd.f32 %v1386_v16, %v1374_v55 }
 0x48f   :  { %vm1431_vm5 = vcmp.eq.f32.partialorder %v1430_v32, 8.507059e+37 }
 0x490   :  { %v2413_v10 = vpop.eup %2412  ;;  %v2243_v53 = vmul.f32 -1.442695, %v1387_v39 }
 0x491   :  { %v3154_v4 = vadd.f32 1.0, %v2413_v10 }
 0x492   :  { %2416 = vpow2.f32 %v2243_v53 }
 0x493   :  { %v1360_v62 = vpop.f32.mrf.mxu2  ;;  %v2415_v50 = vpop.eup %2414  ;;  %vm1411_vm1 = vweird.f32 %v3154_v4 }
 0x494   :  { %v1361_v15 = vadd.f32 %v1360_v62, %v1348_v9  ;;  %v1422_v54 = vmul.f32 %v2415_v50, %v3151_v6  ;;  %vm1427_vm10 = vweird.f32 %v2415_v50 }
 0x495   :  { %v1388_v41 = vpop.f32.mrf.mxu0  ;;  %vm3171_vm13 = vmor %vm1426_vm12, %vm1427_vm10 }
 0x496   :  { %v2242_v49 = vmul.f32 -1.442695, %v1361_v15  ;;  %v1423_v55 = vsub.f32 1.0, %v1422_v54 }
 0x498   :  { %2418 = vpow2.f32 %v2242_v49  ;;  %v2417_v20 = vpop.eup %2416  ;;  %v1424_v39 = vmul.f32 %v2415_v50, %v1423_v55  ;;  %v1417_v55 = vand.u32 2147483648, %v3154_v4 }
 0x499   :  { %2420 = vrcp.f32 %v3154_v4  ;;  %v1405_v13 = vadd.f32 1.0, %v2417_v20 }
 0x49a   :  { %v1425_v41 = vadd.f32 %v2415_v50, %v1424_v39  ;;  %v1418_v60 = vor.u32 1.1754944e-38, %v1417_v55 }
 0x49b   :  { %v1362_v57 = vpop.f32.mrf.mxu2  ;;  %vm1456_vm8 = vweird.f32 %v1405_v13 }
 0x49c   :  { %v1432_v57 = vand.u32 2147483648, %v3151_v6  ;;  %v1429_v39 = vsel %vm3171_vm13, %v2415_v50, %v1425_v41  ;;  %v1415_v6 = vand.u32 2147483647, %v3154_v4 }
 0x49e   :  { %v2419_v35 = vpop.eup %2418  ;;  %vm1416_vm6 = vcmp.eq.f32.partialorder %v1415_v6, 8.507059e+37 }
 0x49f   :  { %v2421_v21 = vpop.eup %2420  ;;  %v1404_v25 = vadd.f32 1.0, %v2419_v35 }
 0x4a0   :  { %v1407_v40 = vmul.f32 %v2421_v21, %v3154_v4  ;;  %vm1412_vm14 = vweird.f32 %v2421_v21 }
 0x4a1   :  { %2422 = vrcp.f32 %v1404_v25  ;;  %v1447_v15 = vand.u32 2147483648, %v1404_v25  ;;  %v1445_v30 = vand.u32 2147483647, %v1404_v25  ;;  %vm1441_vm15 = vweird.f32 %v1404_v25  ;;  %vm1413_vm4 = vmor %vm1411_vm1, %vm1412_vm14 }
 0x4a2   :  { %2424 = vrcp.f32 %v1405_v13  ;;  %v1408_v16 = vsub.f32 1.0, %v1407_v40 }
 0x4a3   :  { %vm1446_vm3 = vcmp.eq.f32.partialorder %v1445_v30, 8.507059e+37  ;;  %v1460_v30 = vand.u32 2147483647, %v1405_v13 }
 0x4a4   :  { %v1409_v53 = vmul.f32 %v2421_v21, %v1408_v16  ;;  %v1448_v16 = vor.u32 1.1754944e-38, %v1447_v15 }
 0x4a5   :  { %vm1461_vm10 = vcmp.eq.f32.partialorder %v1460_v30, 8.507059e+37 }
 0x4a6   :  { %v1410_v54 = vadd.f32 %v2421_v21, %v1409_v53 }
 0x4a7   :  { %v2423_v44 = vpop.eup %2422 }
 0x4a8   :  { %v1437_v10 = vmul.f32 %v2423_v44, %v1404_v25  ;;  %v2425_v9 = vpop.eup %2424  ;;  %vm1442_vm11 = vweird.f32 %v2423_v44 }
 0x4a9   :  { %v1452_v20 = vmul.f32 %v2425_v9, %v1405_v13  ;;  %vm1443_vm2 = vmor %vm1441_vm15, %vm1442_vm11  ;;  %vm1457_vm7 = vweird.f32 %v2425_v9 }
 0x4aa   :  { %v1438_v62 = vsub.f32 1.0, %v1437_v10  ;;  %vm1458_vm9 = vmor %vm1456_vm8, %vm1457_vm7 }
 0x4ab   :  { %v1453_v17 = vsub.f32 1.0, %v1452_v20 }
 0x4ac   :  { %v1439_v49 = vmul.f32 %v2423_v44, %v1438_v62  ;;  %v1433_v62 = vor.u32 1.1754944e-38, %v1432_v57 }
 0x4ad   :  { %v1454_v15 = vmul.f32 %v2425_v9, %v1453_v17 }
 0x4ae   :  { %v1440_v40 = vadd.f32 %v2423_v44, %v1439_v49  ;;  %v1414_v49 = vsel %vm1413_vm4, %v2421_v21, %v1410_v54  ;;  %v1434_v3 = vsel %vm1431_vm5, %v1433_v62, %v1429_v39  ;;  %v3417_v39 = vld [vmem:[#allocation16_spill] sm:$0xff] }
 0x4af   :  { %v1419_v45 = vsel %vm1416_vm6, %v1418_v60, %v1414_v49  ;;  %v1468_v35 = vmul.f32 %v1434_v3, %v3107_v36  ;;  %v1455_v4 = vadd.f32 %v2425_v9, %v1454_v15  ;;  %v3415_v36 = vld [vmem:[#allocation15_spill] sm:$0xff] }
 0x4b0   :  { %v1444_v10 = vsel %vm1443_vm2, %v2423_v44, %v1440_v40  ;;  %v1462_v44 = vand.u32 2147483648, %v1405_v13 }
 0x4b1   :  { %v1449_v53 = vsel %vm1446_vm3, %v1448_v16, %v1444_v10  ;;  %v1459_v21 = vsel %vm1458_vm9, %v2425_v9, %v1455_v4  ;;  %v3416_v9 = vld [vmem:[#allocation18_spill] sm:$0xff] }
 0x4b2   :  { %v1466_v25 = vmul.f32 2.0, %v1449_v53  ;;  %v1463_v32 = vor.u32 1.1754944e-38, %v1462_v44 }
 0x4b4   :  { %v2244_v28 = vadd.f32 -1.0, %v1466_v25  ;;  %v1464_v20 = vsel %vm1461_vm10, %v1463_v32, %v1459_v21 }
 0x4b6   :  { %v1469_v50 = vmul.f32 %v2244_v28, %v1419_v45 }
 0x4b8   :  { %v3181_v41 = vadd.f32 %v1469_v50, %v1468_v35  ;;  %v3418_v50 = vld [vmem:[#allocation19_spill] sm:$0xff] }
 0x4ba   :  { %2426 = vtanh.f32 %v3181_v41 }
 0x4c0   :  { %v2427_v57 = vpop.eup %2426 }
 0x4c1   :  { %v1472_v60 = vmul.f32 %v2427_v57, %v1464_v20  ;;  %v3419_v20 = vld [vmem:[#allocation17_spill] sm:$0xff] }
 0x4c3   :  { %v1473_v17 = vpack.c.bf16 %v1472_v60, %v1472_v60 }
 0x4c5   :  { %1487 = vmatmul.bf16.vlgmr.msra.gmra.mxu2 %v1473_v17  ;;  %1513 = vmatmul.bf16.vlgmr.msra.gmra.mxu0 %v1473_v17 }
 0x4c6   :  { %1539 = vmatmul.bf16.vlgmr.msrb.gmra.mxu3 %v1473_v17  ;;  %1565 = vmatmul.bf16.vlgmr.msrb.gmra.mxu1 %v1473_v17 }
 0x4c7   :  { %1672 = vmatpush.bf16.msra.mxu2 %v2618_v5  ;;  %1698 = vmatpush.bf16.msra.mxu0 %v2631_v18 }
 0x4c8   :  { %1724 = vmatpush.bf16.msrb.mxu3 %v2625_v14  ;;  %1750 = vmatpush.bf16.msrb.mxu1 %v2647_v33 }
 0x4cb   :  { %1673 = vmatpush.bf16.msra.mxu2 %v2637_v24  ;;  %1699 = vmatpush.bf16.msra.mxu0 %v2649_v34 }
 0x4cc   :  { %1725 = vmatpush.bf16.msrb.mxu3 %v2642_v29  ;;  %1751 = vmatpush.bf16.msrb.mxu1 %v2660_v43 }
 0x4cf   :  { %1674 = vmatpush.bf16.msra.mxu2 %v2652_v38  ;;  %1700 = vmatpush.bf16.msra.mxu0 %v2663_v47 }
 0x4d0   :  { %1726 = vmatpush.bf16.msrb.mxu3 %v2658_v42  ;;  %1752 = vmatpush.bf16.msrb.mxu1 %v2673_v59 }
 0x4d3   :  { %1675 = vmatpush.bf16.msra.mxu2 %v2667_v51  ;;  %1701 = vmatpush.bf16.msra.mxu0 %v2676_v61 }
 0x4d4   :  { %1727 = vmatpush.bf16.msrb.mxu3 %v2671_v58  ;;  %1753 = vmatpush.bf16.msrb.mxu1 %v2685_v8 }
 0x4d5   :  { %2247 = vmatmul.msk.bf16.vlgmr.msrb.gmra.mxu2 %vm304_vm0, %v3156_v22  ;;  %2248 = vmatmul.msk.bf16.vlgmr.msrb.gmra.mxu0 %vm304_vm0, %v3156_v22 }
 0x4d7   :  { %1676 = vmatpush.bf16.msra.mxu2 %v2679_v1  ;;  %1702 = vmatpush.bf16.msra.mxu0 %v2688_v12 }
 0x4d8   :  { %1728 = vmatpush.bf16.msrb.mxu3 %v2683_v7  ;;  %1754 = vmatpush.bf16.msrb.mxu1 %v2697_v27 }
 0x4db   :  { %1677 = vmatpush.bf16.msra.mxu2 %v2691_v19  ;;  %1703 = vmatpush.bf16.msra.mxu0 %v2700_v31 }
 0x4dc   :  { %1729 = vmatpush.bf16.msrb.mxu3 %v2695_v26  ;;  %1755 = vmatpush.bf16.msrb.mxu1 %v2711_v48 }
 0x4df   :  { %1678 = vmatpush.bf16.msra.mxu2 %v2705_v37  ;;  %1704 = vmatpush.bf16.msra.mxu0 %v2714_v52 }
 0x4e0   :  { %1730 = vmatpush.bf16.msrb.mxu3 %v2709_v46  ;;  %1756 = vmatpush.bf16.msrb.mxu1 %v2725_v0 }
 0x4e3   :  { %1679 = vmatpush.bf16.msra.mxu2 %v2717_v56  ;;  %1705 = vmatpush.bf16.msra.mxu0 %v2728_v2 }
 0x4e4   :  { %1731 = vmatpush.bf16.msrb.mxu3 %v2723_v63  ;;  %1757 = vmatpush.bf16.msrb.mxu1 %v2736_v11 }
 0x4e7   :  { %1744 = vmatpush.bf16.msrb.mxu2 %v2635_v23  ;;  %1770 = vmatpush.bf16.msrb.mxu0 %v3415_v36 }
 0x4fe   :  { %v1527_v45 = vpop.f32.mrf.mxu1 }
 0x504   :  { %v1501_v28 = vpop.f32.mrf.mxu3 }
 0x506   :  { %v1529_v3 = vpop.f32.mrf.mxu1 }
 0x50c   :  { %v1503_v22 = vpop.f32.mrf.mxu3 }
 0x50d   :  { %v3230_v22 = vpop.permute.xlu0 %1667 }
 0x50e   :  { %2254 = vmatmul.msk.bf16.vlgmr.msra.gmra.mxu3 %vm304_vm0, %v3230_v22  ;;  %2255 = vmatmul.msk.bf16.vlgmr.msra.gmra.mxu1 %vm304_vm0, %v3230_v22 }
 0x50f   :  { %1878 = vmatpush.bf16.msra.mxu3 %v2631_v18  ;;  %1904 = vmatpush.bf16.msra.mxu1 %v2647_v33 }
 0x513   :  { %1879 = vmatpush.bf16.msra.mxu3 %v2649_v34  ;;  %1905 = vmatpush.bf16.msra.mxu1 %v2660_v43 }
 0x517   :  { %1880 = vmatpush.bf16.msra.mxu3 %v2663_v47  ;;  %1906 = vmatpush.bf16.msra.mxu1 %v2673_v59 }
 0x51b   :  { %1881 = vmatpush.bf16.msra.mxu3 %v2676_v61  ;;  %1907 = vmatpush.bf16.msra.mxu1 %v2685_v8 }
 0x51f   :  { %1882 = vmatpush.bf16.msra.mxu3 %v2688_v12  ;;  %1908 = vmatpush.bf16.msra.mxu1 %v2697_v27 }
 0x523   :  { %1883 = vmatpush.bf16.msra.mxu3 %v2700_v31  ;;  %1909 = vmatpush.bf16.msra.mxu1 %v2711_v48 }
 0x527   :  { %1884 = vmatpush.bf16.msra.mxu3 %v2714_v52  ;;  %1910 = vmatpush.bf16.msra.mxu1 %v2725_v0 }
 0x52b   :  { %1885 = vmatpush.bf16.msra.mxu3 %v2728_v2  ;;  %1911 = vmatpush.bf16.msra.mxu1 %v2736_v11 }
 0x542   :  { %v1514_v13 = vpop.f32.mrf.mxu0 }
 0x543   :  { %v1515_v54 = vadd.f32 %v1514_v13, %v3416_v9  ;;  %v1566_v40 = vpop.f32.mrf.mxu1 }
 0x544   :  { %v1567_v4 = vadd.f32 %v1566_v40, %v3418_v50 }
 0x545   :  { %v1528_v55 = vadd.f32 %v1527_v45, %v1515_v54 }
 0x547   :  { %v2250_v62 = vmul.f32 -1.442695, %v1528_v55 }
 0x548   :  { %v1488_v16 = vpop.f32.mrf.mxu2 }
 0x549   :  { %v1489_v6 = vadd.f32 %v1488_v16, %v3417_v39  ;;  %v1540_v10 = vpop.f32.mrf.mxu3  ;;  %2428 = vpow2.f32 %v2250_v62 }
 0x54a   :  { %v1516_v53 = vpop.f32.mrf.mxu0  ;;  %v1541_v60 = vadd.f32 %v1540_v10, %v3419_v20 }
 0x54b   :  { %v1502_v49 = vadd.f32 %v1501_v28, %v1489_v6  ;;  %v1568_v25 = vpop.f32.mrf.mxu1 }
 0x54d   :  { %v2249_v23 = vmul.f32 -1.442695, %v1502_v49 }
 0x54f   :  { %2430 = vpow2.f32 %v2249_v23  ;;  %v2429_v30 = vpop.eup %2428 }
 0x550   :  { %v1490_v15 = vpop.f32.mrf.mxu2  ;;  %v3225_v57 = vadd.f32 1.0, %v2429_v30 }
 0x551   :  { %v1542_v35 = vpop.f32.mrf.mxu3 }
 0x552   :  { %v1579_v44 = vpop.f32.mrf.mxu0  ;;  %2432 = vrcp.f32 %v3225_v57  ;;  %vm1619_vm13 = vweird.f32 %v3225_v57  ;;  %v1623_v12 = vand.u32 2147483647, %v3225_v57  ;;  %v1625_v27 = vand.u32 2147483648, %v3225_v57 }
 0x553   :  { %v1580_v21 = vadd.f32 %v1579_v44, %v1567_v4 }
 0x554   :  { %vm1624_vm6 = vcmp.eq.f32.partialorder %v1623_v12, 8.507059e+37 }
 0x555   :  { %v2431_v32 = vpop.eup %2430  ;;  %v2252_v17 = vmul.f32 -1.442695, %v1580_v21 }
 0x556   :  { %v3228_v28 = vadd.f32 1.0, %v2431_v32 }
 0x557   :  { %2434 = vpow2.f32 %v2252_v17  ;;  %v1626_v17 = vor.u32 1.1754944e-38, %v1625_v27 }
 0x558   :  { %v1553_v36 = vpop.f32.mrf.mxu2  ;;  %v2433_v40 = vpop.eup %2432  ;;  %vm1604_vm2 = vweird.f32 %v3228_v28  ;;  %v1610_v30 = vand.u32 2147483648, %v3228_v28 }
 0x559   :  { %v1554_v45 = vadd.f32 %v1553_v36, %v1541_v60  ;;  %v1615_v18 = vmul.f32 %v2433_v40, %v3225_v57  ;;  %vm1620_vm11 = vweird.f32 %v2433_v40  ;;  %v1608_v57 = vand.u32 2147483647, %v3228_v28 }
 0x55a   :  { %v1581_v3 = vpop.f32.mrf.mxu0  ;;  %vm3263_vm14 = vmor %vm1619_vm13, %vm1620_vm11 }
 0x55b   :  { %v2251_v13 = vmul.f32 -1.442695, %v1554_v45  ;;  %v1616_v43 = vsub.f32 1.0, %v1615_v18  ;;  %vm1609_vm7 = vcmp.eq.f32.partialorder %v1608_v57, 8.507059e+37 }
 0x55d   :  { %2436 = vpow2.f32 %v2251_v13  ;;  %v2435_v55 = vpop.eup %2434  ;;  %v1617_v47 = vmul.f32 %v2433_v40, %v1616_v43 }
 0x55e   :  { %2438 = vrcp.f32 %v3228_v28  ;;  %v3247_v33 = vadd.f32 1.0, %v2435_v55  ;;  %v1611_v55 = vor.u32 1.1754944e-38, %v1610_v30 }
 0x55f   :  { %v1618_v61 = vadd.f32 %v2433_v40, %v1617_v47 }
 0x560   :  { %v1555_v54 = vpop.f32.mrf.mxu2  ;;  %vm1649_vm9 = vweird.f32 %v3247_v33  ;;  %v1653_v2 = vand.u32 2147483647, %v3247_v33 }
 0x561   :  { %v1622_v32 = vsel %vm3263_vm14, %v2433_v40, %v1618_v61 }
 0x562   :  { %v1627_v54 = vsel %vm1624_vm6, %v1626_v17, %v1622_v32  ;;  %vm1654_vm11 = vcmp.eq.f32.partialorder %v1653_v2, 8.507059e+37 }
 0x563   :  { %v2437_v16 = vpop.eup %2436  ;;  %v1661_v40 = vmul.f32 %v1627_v54, %v3181_v41 }
 0x564   :  { %v3242_v6 = vpop.eup %2438  ;;  %v1597_v10 = vadd.f32 1.0, %v2437_v16 }
 0x565   :  { %v1600_v34 = vmul.f32 %v3242_v6, %v3228_v28  ;;  %vm1605_vm15 = vweird.f32 %v3242_v6 }
 0x566   :  { %2440 = vrcp.f32 %v1597_v10  ;;  %v1640_v15 = vand.u32 2147483648, %v1597_v10  ;;  %v1638_v35 = vand.u32 2147483647, %v1597_v10  ;;  %vm1634_vm1 = vweird.f32 %v1597_v10  ;;  %vm1606_vm5 = vmor %vm1604_vm2, %vm1605_vm15 }
 0x567   :  { %2442 = vrcp.f32 %v3247_v33  ;;  %v1601_v62 = vsub.f32 1.0, %v1600_v34 }
 0x568   :  { %v1641_v21 = vor.u32 1.1754944e-38, %v1640_v15  ;;  %vm1639_vm4 = vcmp.eq.f32.partialorder %v1638_v35, 8.507059e+37 }
 0x569   :  { %v1602_v25 = vmul.f32 %v3242_v6, %v1601_v62 }
 0x56b   :  { %v1603_v31 = vadd.f32 %v3242_v6, %v1602_v25 }
 0x56c   :  { %v2441_v53 = vpop.eup %2440 }
 0x56d   :  { %v1630_v59 = vmul.f32 %v2441_v53, %v1597_v10  ;;  %v2443_v49 = vpop.eup %2442  ;;  %vm1635_vm12 = vweird.f32 %v2441_v53  ;;  %v1607_v3 = vsel %vm1606_vm5, %v3242_v6, %v1603_v31  ;;  %v1655_v6 = vand.u32 2147483648, %v3247_v33 }
 0x56e   :  { %v1645_v4 = vmul.f32 %v2443_v49, %v3247_v33  ;;  %vm1636_vm3 = vmor %vm1634_vm1, %vm1635_vm12  ;;  %v1612_v0 = vsel %vm1609_vm7, %v1611_v55, %v1607_v3  ;;  %vm1650_vm8 = vweird.f32 %v2443_v49 }
 0x56f   :  { %v1631_v23 = vsub.f32 1.0, %v1630_v59  ;;  %vm1651_vm10 = vmor %vm1649_vm9, %vm1650_vm8  ;;  %v1656_v34 = vor.u32 1.1754944e-38, %v1655_v6 }
 0x570   :  { %v1646_v36 = vsub.f32 1.0, %v1645_v4 }
 0x571   :  { %v1632_v8 = vmul.f32 %v2441_v53, %v1631_v23 }
 0x572   :  { %v1647_v28 = vmul.f32 %v2443_v49, %v1646_v36 }
 0x573   :  { %v1633_v48 = vadd.f32 %v2441_v53, %v1632_v8 }
 0x574   :  { %v1648_v18 = vadd.f32 %v2443_v49, %v1647_v28 }
 0x575   :  { %v1637_v60 = vsel %vm1636_vm3, %v2441_v53, %v1633_v48 }
 0x576   :  { %v1642_v45 = vsel %vm1639_vm4, %v1641_v21, %v1637_v60  ;;  %v1652_v11 = vsel %vm1651_vm10, %v2443_v49, %v1648_v18 }
 0x577   :  { %v1659_v13 = vmul.f32 2.0, %v1642_v45  ;;  %v1657_v62 = vsel %vm1654_vm11, %v1656_v34, %v1652_v11 }
 0x579   :  { %v2253_v52 = vadd.f32 -1.0, %v1659_v13  ;;  %v2318_v13 = vld [vmem:[%s3343_s3] ss:$0 sm:$0xff] }
 0x57a   :  { %2003 = vrot.lane.b32.xlu1 %v2318_v13, %s2572_s11 }
 0x57b   :  { %v1662_v16 = vmul.f32 %v2253_v52, %v1612_v0 }
 0x57d   :  { %v3280_v10 = vadd.f32 %v1662_v16, %v1661_v40 }
 0x57f   :  { %2444 = vtanh.f32 %v3280_v10 }
 0x585   :  { %v2445_v43 = vpop.eup %2444 }
 0x586   :  { %v1665_v41 = vmul.f32 %v2445_v43, %v1657_v62 }
 0x588   :  { %v1666_v53 = vpack.c.bf16 %v1665_v41, %v1665_v41 }
 0x58a   :  { %1680 = vmatmul.bf16.vlgmr.msra.gmra.mxu2 %v1666_v53  ;;  %1706 = vmatmul.bf16.vlgmr.msra.gmra.mxu0 %v1666_v53 }
 0x58b   :  { %1732 = vmatmul.bf16.vlgmr.msrb.gmra.mxu3 %v1666_v53  ;;  %1758 = vmatmul.bf16.vlgmr.msrb.gmra.mxu1 %v1666_v53 }
 0x58c   :  { %1865 = vmatpush.bf16.msra.mxu2 %v2618_v5  ;;  %1891 = vmatpush.bf16.msra.mxu0 %v2625_v14  ;;  %v1720_v5 = vpop.f32.mrf.mxu1 }
 0x590   :  { %1866 = vmatpush.bf16.msra.mxu2 %v2637_v24  ;;  %1892 = vmatpush.bf16.msra.mxu0 %v2642_v29 }
 0x591   :  { %v1694_v14 = vpop.f32.mrf.mxu3 }
 0x594   :  { %1867 = vmatpush.bf16.msra.mxu2 %v2652_v38  ;;  %1893 = vmatpush.bf16.msra.mxu0 %v2658_v42  ;;  %v1722_v24 = vpop.f32.mrf.mxu1 }
 0x598   :  { %1868 = vmatpush.bf16.msra.mxu2 %v2667_v51  ;;  %1894 = vmatpush.bf16.msra.mxu0 %v2671_v58 }
 0x599   :  { %v1696_v29 = vpop.f32.mrf.mxu3 }
 0x59a   :  { %2256 = vmatmul.msk.bf16.vlgmr.msrb.gmra.mxu2 %vm304_vm0, %v3230_v22  ;;  %2257 = vmatmul.msk.bf16.vlgmr.msrb.gmra.mxu0 %vm304_vm0, %v3230_v22 }
 0x59c   :  { %1869 = vmatpush.bf16.msra.mxu2 %v2679_v1  ;;  %1895 = vmatpush.bf16.msra.mxu0 %v2683_v7 }
 0x5a0   :  { %1870 = vmatpush.bf16.msra.mxu2 %v2691_v19  ;;  %1896 = vmatpush.bf16.msra.mxu0 %v2695_v26 }
 0x5a4   :  { %1871 = vmatpush.bf16.msra.mxu2 %v2705_v37  ;;  %1897 = vmatpush.bf16.msra.mxu0 %v2709_v46 }
 0x5a8   :  { %1872 = vmatpush.bf16.msra.mxu2 %v2717_v56  ;;  %1898 = vmatpush.bf16.msra.mxu0 %v2723_v63 }
 0x607   :  { %v1707_v38 = vpop.f32.mrf.mxu0 }
 0x608   :  { %v1708_v42 = vadd.f32 %v1707_v38, %v3416_v9  ;;  %v1759_v51 = vpop.f32.mrf.mxu1 }
 0x609   :  { %v1760_v47 = vadd.f32 %v1759_v51, %v3418_v50 }
 0x60a   :  { %v1721_v58 = vadd.f32 %v1720_v5, %v1708_v42 }
 0x60c   :  { %v2259_v26 = vmul.f32 -1.442695, %v1721_v58 }
 0x60d   :  { %v1681_v1 = vpop.f32.mrf.mxu2 }
 0x60e   :  { %v1682_v7 = vadd.f32 %v1681_v1, %v3417_v39  ;;  %v1733_v19 = vpop.f32.mrf.mxu3  ;;  %2446 = vpow2.f32 %v2259_v26 }
 0x60f   :  { %v1709_v37 = vpop.f32.mrf.mxu0  ;;  %v1734_v61 = vadd.f32 %v1733_v19, %v3419_v20 }
 0x610   :  { %v1695_v46 = vadd.f32 %v1694_v14, %v1682_v7  ;;  %v1761_v22 = vpop.f32.mrf.mxu1 }
 0x612   :  { %v2258_v56 = vmul.f32 -1.442695, %v1695_v46 }
 0x614   :  { %2448 = vpow2.f32 %v2258_v56  ;;  %v2447_v49 = vpop.eup %2446 }
 0x615   :  { %v1683_v63 = vpop.f32.mrf.mxu2  ;;  %v1789_v15 = vadd.f32 1.0, %v2447_v49 }
 0x616   :  { %v1735_v33 = vpop.f32.mrf.mxu3 }
 0x617   :  { %v1772_v59 = vpop.f32.mrf.mxu0  ;;  %2450 = vrcp.f32 %v1789_v15  ;;  %vm1812_vm13 = vweird.f32 %v1789_v15  ;;  %v1816_v11 = vand.u32 2147483647, %v1789_v15  ;;  %v1818_v34 = vand.u32 2147483648, %v1789_v15 }
 0x618   :  { %v1773_v25 = vadd.f32 %v1772_v59, %v1760_v47 }
 0x619   :  { %v1819_v42 = vor.u32 1.1754944e-38, %v1818_v34  ;;  %vm1817_vm6 = vcmp.eq.f32.partialorder %v1816_v11, 8.507059e+37 }
 0x61a   :  { %v2449_v23 = vpop.eup %2448  ;;  %v2261_v8 = vmul.f32 -1.442695, %v1773_v25 }
 0x61b   :  { %v1788_v27 = vadd.f32 1.0, %v2449_v23 }
 0x61c   :  { %2452 = vpow2.f32 %v2261_v8 }
 0x61d   :  { %v1746_v35 = vpop.f32.mrf.mxu2  ;;  %v2451_v48 = vpop.eup %2450  ;;  %vm1797_vm2 = vweird.f32 %v1788_v27  ;;  %v1803_v5 = vand.u32 2147483648, %v1788_v27  ;;  %v1801_v29 = vand.u32 2147483647, %v1788_v27 }
 0x61e   :  { %v1747_v12 = vadd.f32 %v1746_v35, %v1734_v61  ;;  %v1808_v60 = vmul.f32 %v2451_v48, %v1789_v15  ;;  %vm1813_vm0 = vweird.f32 %v2451_v48 }
 0x61f   :  { %v1774_v4 = vpop.f32.mrf.mxu0  ;;  %vm3314_vm14 = vmor %vm1812_vm13, %vm1813_vm0  ;;  %v1804_v26 = vor.u32 1.1754944e-38, %v1803_v5  ;;  %vm1802_vm7 = vcmp.eq.f32.partialorder %v1801_v29, 8.507059e+37 }
 0x620   :  { %v2260_v44 = vmul.f32 -1.442695, %v1747_v12  ;;  %v1809_v45 = vsub.f32 1.0, %v1808_v60 }
 0x622   :  { %2454 = vpow2.f32 %v2260_v44  ;;  %v2453_v30 = vpop.eup %2452  ;;  %v1810_v55 = vmul.f32 %v2451_v48, %v1809_v45 }
 0x623   :  { %2456 = vrcp.f32 %v1788_v27  ;;  %v1791_v17 = vadd.f32 1.0, %v2453_v30 }
 0x624   :  { %v1811_v18 = vadd.f32 %v2451_v48, %v1810_v55 }
 0x625   :  { %v1748_v31 = vpop.f32.mrf.mxu2  ;;  %v1848_v59 = vand.u32 2147483648, %v1791_v17  ;;  %vm1842_vm9 = vweird.f32 %v1791_v17  ;;  %v1846_v49 = vand.u32 2147483647, %v1791_v17 }
 0x626   :  { %v1815_v24 = vsel %vm3314_vm14, %v2451_v48, %v1811_v18 }
 0x627   :  { %v1820_v19 = vsel %vm1817_vm6, %v1819_v42, %v1815_v24  ;;  %v1849_v23 = vor.u32 1.1754944e-38, %v1848_v59  ;;  %vm1847_vm11 = vcmp.eq.f32.partialorder %v1846_v49, 8.507059e+37 }
 0x628   :  { %v2455_v21 = vpop.eup %2454  ;;  %v1854_v56 = vmul.f32 %v1820_v19, %v3280_v10 }
 0x629   :  { %v2457_v32 = vpop.eup %2456  ;;  %v1790_v57 = vadd.f32 1.0, %v2455_v21 }
 0x62a   :  { %v1793_v36 = vmul.f32 %v2457_v32, %v1788_v27  ;;  %vm1798_vm15 = vweird.f32 %v2457_v32 }
 0x62b   :  { %2458 = vrcp.f32 %v1790_v57  ;;  %v1833_v16 = vand.u32 2147483648, %v1790_v57  ;;  %v1831_v2 = vand.u32 2147483647, %v1790_v57  ;;  %vm1827_vm1 = vweird.f32 %v1790_v57  ;;  %vm1799_vm5 = vmor %vm1797_vm2, %vm1798_vm15 }
 0x62c   :  { %2460 = vrcp.f32 %v1791_v17  ;;  %v1794_v3 = vsub.f32 1.0, %v1793_v36 }
 0x62d   :  { %v1834_v14 = vor.u32 1.1754944e-38, %v1833_v16  ;;  %vm1832_vm4 = vcmp.eq.f32.partialorder %v1831_v2, 8.507059e+37 }
 0x62e   :  { %v1795_v28 = vmul.f32 %v2457_v32, %v1794_v3 }
 0x630   :  { %v1796_v41 = vadd.f32 %v2457_v32, %v1795_v28 }
 0x631   :  { %v2459_v54 = vpop.eup %2458 }
 0x632   :  { %v1823_v52 = vmul.f32 %v2459_v54, %v1790_v57  ;;  %v2461_v0 = vpop.eup %2460  ;;  %vm1828_vm12 = vweird.f32 %v2459_v54  ;;  %v1800_v1 = vsel %vm1799_vm5, %v2457_v32, %v1796_v41 }
 0x633   :  { %v1838_v43 = vmul.f32 %v2461_v0, %v1791_v17  ;;  %vm1829_vm3 = vmor %vm1827_vm1, %vm1828_vm12  ;;  %v1805_v46 = vsel %vm1802_vm7, %v1804_v26, %v1800_v1  ;;  %vm1843_vm8 = vweird.f32 %v2461_v0 }
 0x634   :  { %v1824_v40 = vsub.f32 1.0, %v1823_v52  ;;  %vm1844_vm10 = vmor %vm1842_vm9, %vm1843_vm8 }
 0x635   :  { %v1839_v51 = vsub.f32 1.0, %v1838_v43 }
 0x636   :  { %v1825_v6 = vmul.f32 %v2459_v54, %v1824_v40 }
 0x637   :  { %v1840_v22 = vmul.f32 %v2461_v0, %v1839_v51 }
 0x638   :  { %v1826_v53 = vadd.f32 %v2459_v54, %v1825_v6 }
 0x639   :  { %v1841_v47 = vadd.f32 %v2461_v0, %v1840_v22 }
 0x63a   :  { %v1830_v38 = vsel %vm1829_vm3, %v2459_v54, %v1826_v53 }
 0x63b   :  { %v1835_v58 = vsel %vm1832_vm4, %v1834_v14, %v1830_v38  ;;  %v1845_v25 = vsel %vm1844_vm10, %v2461_v0, %v1841_v47 }
 0x63c   :  { %v1852_v7 = vmul.f32 2.0, %v1835_v58  ;;  %v1850_v61 = vsel %vm1847_vm11, %v1849_v23, %v1845_v25 }
 0x63e   :  { %v2262_v37 = vadd.f32 -1.0, %v1852_v7 }
 0x640   :  { %v1855_v63 = vmul.f32 %v2262_v37, %v1805_v46 }
 0x642   :  { %v3321_v33 = vadd.f32 %v1855_v63, %v1854_v56 }
 0x644   :  { %2462 = vtanh.f32 %v3321_v33 }
 0x64a   :  { %v2463_v15 = vpop.eup %2462 }
 0x64b   :  { %v1858_v8 = vmul.f32 %v2463_v15, %v1850_v61 }
 0x64d   :  { %v1859_v35 = vpack.c.bf16 %v1858_v8, %v1858_v8 }
 0x64f   :  { %1860 = vst [vmem:[#allocation2] sm:$0xf] %v1859_v35  ;;  %1873 = vmatmul.bf16.vlgmr.msra.gmra.mxu2 %v1859_v35  ;;  %1886 = vmatmul.bf16.vlgmr.msra.gmra.mxu3 %v1859_v35 }
 0x650   :  { %1899 = vmatmul.bf16.vlgmr.msra.gmra.mxu0 %v1859_v35  ;;  %1912 = vmatmul.bf16.vlgmr.msra.gmra.mxu1 %v1859_v35 }
 0x6cd   :  { %v1900_v10 = vpop.f32.mrf.mxu0  ;;  %v1913_v12 = vpop.f32.mrf.mxu1 }
 0x6ce   :  { %v1901_v27 = vadd.f32 %v1900_v10, %v3419_v20  ;;  %v1914_v4 = vadd.f32 %v1913_v12, %v3418_v50 }
 0x6d0   :  { %v2265_v44 = vmul.f32 -1.442695, %v1901_v27  ;;  %v2266_v31 = vmul.f32 -1.442695, %v1914_v4 }
 0x6d2   :  { %2464 = vpow2.f32 %v2265_v44  ;;  %v1874_v48 = vpop.f32.mrf.mxu2  ;;  %v1887_v30 = vpop.f32.mrf.mxu3 }
 0x6d3   :  { %2466 = vpow2.f32 %v2266_v31  ;;  %v1875_v21 = vadd.f32 %v1874_v48, %v3417_v39  ;;  %v1888_v32 = vadd.f32 %v1887_v30, %v3416_v9  ;;  %v2004_v48 = vpop.permute.xlu1 %2003 }
 0x6d5   :  { %v2263_v57 = vmul.f32 -1.442695, %v1875_v21  ;;  %v2264_v60 = vmul.f32 -1.442695, %v1888_v32  ;;  %v1902_v17 = vpop.f32.mrf.mxu0  ;;  %v1915_v36 = vpop.f32.mrf.mxu1 }
 0x6d7   :  { %2468 = vpow2.f32 %v2263_v57 }
 0x6d8   :  { %v2465_v45 = vpop.eup %2464  ;;  %2470 = vpow2.f32 %v2264_v60  ;;  %v2319_v60 = vld [vmem:[#allocation4] ss:$0 sm:$0xff] }
 0x6d9   :  { %v2467_v20 = vpop.eup %2466  ;;  %v1931_v3 = vadd.f32 1.0, %v2465_v45 }
 0x6da   :  { %v1876_v50 = vpop.f32.mrf.mxu2  ;;  %v1889_v13 = vpop.f32.mrf.mxu3  ;;  %v3328_v54 = vadd.f32 1.0, %v2467_v20 }
 0x6db   :  { %2472 = vrcp.f32 %v1931_v3  ;;  %v1972_v18 = vand.u32 2147483647, %v1931_v3  ;;  %v1974_v6 = vand.u32 2147483648, %v1931_v3  ;;  %vm1968_vm12 = vweird.f32 %v1931_v3 }
 0x6dc   :  { %2474 = vrcp.f32 %v3328_v54  ;;  %v1989_v12 = vand.u32 2147483648, %v3328_v54  ;;  %vm1983_vm9 = vweird.f32 %v3328_v54  ;;  %v1987_v27 = vand.u32 2147483647, %v3328_v54 }
 0x6dd   :  { %v2469_v55 = vpop.eup %2468  ;;  %vm1973_vm14 = vcmp.eq.f32.partialorder %v1972_v18, 8.507059e+37  ;;  %v1975_v53 = vor.u32 1.1754944e-38, %v1974_v6 }
 0x6de   :  { %v2471_v52 = vpop.eup %2470  ;;  %v1929_v0 = vadd.f32 1.0, %v2469_v55  ;;  %v1990_v44 = vor.u32 1.1754944e-38, %v1989_v12  ;;  %vm1988_vm11 = vcmp.eq.f32.partialorder %v1987_v27, 8.507059e+37 }
 0x6df   :  { %v1930_v9 = vadd.f32 1.0, %v2471_v52 }
 0x6e0   :  { %2476 = vrcp.f32 %v1929_v0  ;;  %v1944_v24 = vand.u32 2147483648, %v1929_v0  ;;  %v1942_v38 = vand.u32 2147483647, %v1929_v0  ;;  %vm1938_vm2 = vweird.f32 %v1929_v0 }
 0x6e1   :  { %v2473_v39 = vpop.eup %2472  ;;  %2478 = vrcp.f32 %v1930_v9  ;;  %v1959_v58 = vand.u32 2147483648, %v1930_v9  ;;  %v1957_v19 = vand.u32 2147483647, %v1930_v9  ;;  %vm1953_vm4 = vweird.f32 %v1930_v9 }
 0x6e2   :  { %v1964_v28 = vmul.f32 %v2473_v39, %v1931_v3  ;;  %v2475_v16 = vpop.eup %2474  ;;  %vm1969_vm0 = vweird.f32 %v2473_v39  ;;  %v1945_v22 = vor.u32 1.1754944e-38, %v1944_v24  ;;  %vm1943_vm6 = vcmp.eq.f32.partialorder %v1942_v38, 8.507059e+37 }
 0x6e3   :  { %vm1970_vm13 = vmor %vm1968_vm12, %vm1969_vm0  ;;  %v1979_v14 = vmul.f32 %v2475_v16, %v3328_v54  ;;  %v1960_v63 = vor.u32 1.1754944e-38, %v1959_v58  ;;  %vm1958_vm7 = vcmp.eq.f32.partialorder %v1957_v19, 8.507059e+37  ;;  %vm1984_vm8 = vweird.f32 %v2475_v16 }
 0x6e4   :  { %v1965_v40 = vsub.f32 1.0, %v1964_v28  ;;  %vm1985_vm10 = vmor %vm1983_vm9, %vm1984_vm8  ;;  %vm2011_vm0 = vcmask 523264  }
 0x6e5   :  { %v1980_v46 = vsub.f32 1.0, %v1979_v14 }
 0x6e6   :  { %v2477_v2 = vpop.eup %2476  ;;  %v1966_v11 = vmul.f32 %v2473_v39, %v1965_v40 }
 0x6e7   :  { %v2479_v34 = vpop.eup %2478  ;;  %v1934_v43 = vmul.f32 %v2477_v2, %v1929_v0  ;;  %vm1939_vm15 = vweird.f32 %v2477_v2  ;;  %v1981_v15 = vmul.f32 %v2475_v16, %v1980_v46 }
 0x6e8   :  { %v1967_v62 = vadd.f32 %v2473_v39, %v1966_v11  ;;  %v1949_v41 = vmul.f32 %v2479_v34, %v1930_v9  ;;  %vm1954_vm1 = vweird.f32 %v2479_v34  ;;  %vm1940_vm3 = vmor %vm1938_vm2, %vm1939_vm15 }
 0x6e9   :  { %v1935_v5 = vsub.f32 1.0, %v1934_v43  ;;  %vm1955_vm5 = vmor %vm1953_vm4, %vm1954_vm1  ;;  %v1982_v10 = vadd.f32 %v2475_v16, %v1981_v15 }
 0x6ea   :  { %v1950_v29 = vsub.f32 1.0, %v1949_v41  ;;  %v1971_v42 = vsel %vm1970_vm13, %v2473_v39, %v1967_v62 }
 0x6eb   :  { %v1936_v51 = vmul.f32 %v2477_v2, %v1935_v5  ;;  %v1976_v1 = vsel %vm1973_vm14, %v1975_v53, %v1971_v42  ;;  %v1986_v4 = vsel %vm1985_vm10, %v2475_v16, %v1982_v10  ;;  %vm2039_vm14 = vcmask 7168  }
 0x6ec   :  { %v1951_v7 = vmul.f32 %v2479_v34, %v1950_v29  ;;  %v1993_v26 = vmul.f32 2.0, %v1976_v1  ;;  %v1991_v30 = vsel %vm1988_vm11, %v1990_v44, %v1986_v4 }
 0x6ed   :  { %v1937_v37 = vadd.f32 %v2477_v2, %v1936_v51 }
 0x6ee   :  { %v1952_v56 = vadd.f32 %v2479_v34, %v1951_v7  ;;  %v2267_v59 = vadd.f32 -1.0, %v1993_v26 }
 0x6ef   :  { %v1941_v47 = vsel %vm1940_vm3, %v2477_v2, %v1937_v37 }
 0x6f0   :  { %v1946_v49 = vsel %vm1943_vm6, %v1945_v22, %v1941_v47  ;;  %v1956_v25 = vsel %vm1955_vm5, %v2479_v34, %v1952_v56 }
 0x6f1   :  { %v1961_v23 = vsel %vm1958_vm7, %v1960_v63, %v1956_v25  ;;  %v1996_v61 = vmul.f32 %v2267_v59, %v1946_v49 }
 0x6f2   :  { %v1995_v8 = vmul.f32 %v1961_v23, %v3321_v33 }
 0x6f4   :  { %v1997_v35 = vadd.f32 %v1996_v61, %v1995_v8 }
 0x6f6   :  { %2480 = vtanh.f32 %v1997_v35 }
 0x6fc   :  { %v2481_v31 = vpop.eup %2480 }
 0x6fd   :  { %v1999_v21 = vmul.f32 %v2481_v31, %v1991_v30 }
 0x6ff   :  { %v2006_v32 = vmul.f32 %v2004_v48, %v1999_v21 }
 0x701   :  { %2008 = vrot.lane.b32.xlu2 %v2006_v32, %s2572_s11 }
 0x75b   :  { %v2009_v33 = vpop.permute.xlu2 %2008 }
 0x75c   :  { %v2012_v57 = vsel %vm2011_vm0, %v2009_v33, 0.0 }
 0x75d   :  { %2013 = vadd.xlane.f32.xlu0 %v2012_v57 }
 0x7d0   :  { %v2014_v17 = vpop.xlane.xlu0 %2013 }
 0x7d1   :  { %v2019_v36 = vadd.f32 %v2319_v60, %v2014_v17 }
 0x7d3   :  { %v2268_v45 = vmul.f32 -1.442695, %v2019_v36 }
 0x7d5   :  { %2482 = vpow2.f32 %v2268_v45 }
 0x7db   :  { %v2483_v20 = vpop.eup %2482 }
 0x7dc   :  { %v2023_v3 = vadd.f32 1.0, %v2483_v20 }
 0x7de   :  { %2484 = vrcp.f32 %v2023_v3  ;;  %v2035_v55 = vand.u32 2147483648, %v2023_v3  ;;  %v2033_v0 = vand.u32 2147483647, %v2023_v3  ;;  %vm2029_vm13 = vweird.f32 %v2023_v3 }
 0x7e0   :  { %v2036_v39 = vor.u32 1.1754944e-38, %v2035_v55  ;;  %vm2034_vm1 = vcmp.eq.f32.partialorder %v2033_v0, 8.507059e+37 }
 0x7e4   :  { %v2485_v50 = vpop.eup %2484 }
 0x7e5   :  { %v2025_v13 = vmul.f32 %v2485_v50, %v2023_v3  ;;  %vm2030_vm12 = vweird.f32 %v2485_v50 }
 0x7e6   :  { %vm2031_vm15 = vmor %vm2029_vm13, %vm2030_vm12 }
 0x7e7   :  { %v2026_v54 = vsub.f32 1.0, %v2025_v13 }
 0x7e9   :  { %v2027_v52 = vmul.f32 %v2485_v50, %v2026_v54 }
 0x7eb   :  { %v2028_v9 = vadd.f32 %v2485_v50, %v2027_v52 }
 0x7ed   :  { %v2032_v28 = vsel %vm2031_vm15, %v2485_v50, %v2028_v9 }
 0x7ee   :  { %v2037_v40 = vsel %vm2034_vm1, %v2036_v39, %v2032_v28 }
 0x7ef   :  { %2040 = vst.msk [vmem:[%s3345_s5] sm:$0xff] %vm2039_vm14, %v2037_v40 }
 0x7f0   :  { %2045 = vsyncpa [#allocation6], 1 }
 0x7f1   :  { %2046 = vsyncpa [#allocation8], 1 }

</bundles_post_ra>
